<compile_context>
chip_gen: v7x
topology: tpu7x:2x2x1
jax: 0.10.0
libtpu: 0.0.40
codegen_flags: <defaults>
</compile_context>

<pallas_src>
import math

import jax
import jax.numpy as jnp
from jax.experimental import pallas as pl
from jax.experimental.pallas import tpu as pltpu

# ----------------------- toy LlamaConfig -----------------------
HIDDEN = 128
NUM_HEADS = 4
NUM_KV_HEADS = 2
HEAD_DIM = HIDDEN // NUM_HEADS             # 32
NUM_KV_GROUPS = NUM_HEADS // NUM_KV_HEADS  # 2
ROPE_THETA = 10000.0
ATTENTION_DROPOUT = 0.0                    # eval mode -> dropout is a no-op
BATCH = 2
SEQ = 16

# Column offsets inside the fused projection weight [Wq | Wq_rot | Wk | Wk_rot | Wv]
_Q_OFF = 0
_QR_OFF = NUM_HEADS * HEAD_DIM                  # 128
_K_OFF = _QR_OFF + NUM_HEADS * HEAD_DIM         # 256
_KR_OFF = _K_OFF + NUM_KV_HEADS * HEAD_DIM      # 320
_V_OFF = _KR_OFF + NUM_KV_HEADS * HEAD_DIM      # 384
_PROJ_COLS = _V_OFF + NUM_KV_HEADS * HEAD_DIM   # 448

# TODO(synk): reduce_key_states / demonstration_intervals only apply when a KV
# cache makes key_len > q_len (decode with past_key_value); no cache is modeled
# here, so that branch (and past_key_value.update) is intentionally omitted.


# ----------------------- fused Pallas kernel -----------------------
def _fused_attention_kernel(x_ref, w_all_ref, wo_ref,
                            cosq_ref, sinq_ref, cosk_ref, sink_ref, o_ref):
    """Whole MyLlamaAttention forward for a block of `bb` batch elements.

    x_ref:    (bb, S, HIDDEN)        bf16
    w_all_ref:(HIDDEN, 448)          bf16  [Wq | Wq_rot | Wk | Wk_rot | Wv]
    wo_ref:   (HIDDEN, HIDDEN)       bf16  (pre-transposed o_proj)
    cosq/sinq:(bb*S, HIDDEN)         f32   (1/sqrt(D) scale folded in)
    cosk/sink:(bb*S, NUM_KV_HEADS*D) f32
    o_ref:    (bb, S, HIDDEN)        f32   (lane-dense, 128 lanes)
    """
    bb = x_ref.shape[0]
    s = x_ref.shape[1]

    # --- fused projections: one lane-dense MXU matmul for q, q_rot, k, k_rot, v
    x2 = x_ref[...].reshape(bb * s, HIDDEN)                       # (bb*S, 128) bf16
    proj = jnp.dot(x2, w_all_ref[...],
                   preferred_element_type=jnp.float32)            # (bb*S, 448) f32

    q_lin = proj[:, _Q_OFF:_QR_OFF]                               # (bb*S, 128)
    qr_lin = proj[:, _QR_OFF:_K_OFF]                              # (bb*S, 128)
    k_lin = proj[:, _K_OFF:_KR_OFF]                               # (bb*S, 64)
    kr_lin = proj[:, _KR_OFF:_V_OFF]                              # (bb*S, 64)
    v_lin = proj[:, _V_OFF:_PROJ_COLS]                            # (bb*S, 64)

    # --- RoPE as two full-lane VPU FMAs (rotate_half sign/permutation lives in
    #     Wq_rot / Wk_rot; softmax scale lives in the Q tables).
    q = (q_lin * cosq_ref[...] + qr_lin * sinq_ref[...]).astype(jnp.bfloat16)
    k = (k_lin * cosk_ref[...] + kr_lin * sink_ref[...]).astype(jnp.bfloat16)
    v = v_lin.astype(jnp.bfloat16)

    # --- group-stacked causal mask: (G*S, S), same for every batch / KV head.
    row = jax.lax.broadcasted_iota(jnp.int32, (s, s), 0)
    col = jax.lax.broadcasted_iota(jnp.int32, (s, s), 1)
    causal = col <= row
    keep = jnp.concatenate([causal] * NUM_KV_GROUPS, axis=0)      # (G*S, S)
    neg_inf = jnp.finfo(jnp.float32).min

    for b in range(bb):                                           # static unroll
        r0 = b * s
        qb = q[r0:r0 + s]                                         # (S, 128) bf16
        kb = k[r0:r0 + s]                                         # (S, 64)  bf16
        vb = v[r0:r0 + s]                                         # (S, 64)  bf16

        out_acc = jnp.zeros((s, HIDDEN), jnp.float32)

        for hk in range(NUM_KV_HEADS):
            # Stack this KV head's query-head group along rows: (G*S, D).
            q_grp = jnp.concatenate(
                [qb[:, (hk * NUM_KV_GROUPS + g) * HEAD_DIM:
                        (hk * NUM_KV_GROUPS + g + 1) * HEAD_DIM]
                 for g in range(NUM_KV_GROUPS)],
                axis=0)                                           # (G*S, D) bf16
            kh = kb[:, hk * HEAD_DIM:(hk + 1) * HEAD_DIM]         # (S, D)
            vh = vb[:, hk * HEAD_DIM:(hk + 1) * HEAD_DIM]         # (S, D)

            scores = jax.lax.dot_general(
                q_grp, kh, (((1,), (1,)), ((), ())),
                preferred_element_type=jnp.float32)               # (G*S, S) f32
            scores = jnp.where(keep, scores, neg_inf)

            m = jnp.max(scores, axis=-1, keepdims=True)
            p = jnp.exp(scores - m)
            inv = pl.reciprocal(jnp.sum(p, axis=-1, keepdims=True), approx=True)
            w = (p * inv).astype(jnp.bfloat16)                    # dropout p=0 -> no-op

            out_grp = jnp.dot(w, vh,
                              preferred_element_type=jnp.float32)  # (G*S, D) f32

            # Per-head o_proj accumulation: lane-dense (.,32)@(32,128)->(S,128),
            # no final concat of head outputs.
            for g in range(NUM_KV_GROUPS):
                h = hk * NUM_KV_GROUPS + g
                out_acc = out_acc + jnp.dot(
                    out_grp[g * s:(g + 1) * s].astype(jnp.bfloat16),
                    wo_ref[h * HEAD_DIM:(h + 1) * HEAD_DIM, :],
                    preferred_element_type=jnp.float32)

        # Single unmasked full-128-lane store per batch element.
        # (Could be bf16 if downstream tolerates it; kept f32 here.)
        o_ref[b] = out_acc


# ----------------------- one-time parameter prep -----------------------
def _fold_rotate_half_into_weight(w_t, n_heads):
    """Columns of w_t permuted/signed so that x @ w_rot == rotate_half(x @ w_t)."""
    w = w_t.reshape(HIDDEN, n_heads, 2, HEAD_DIM // 2)
    w_rot = jnp.concatenate([-w[:, :, 1:2, :], w[:, :, 0:1, :]], axis=2)
    return w_rot.reshape(HIDDEN, n_heads * HEAD_DIM)


def prepare_attention_params(params):
    """Hoisted out of the forward: transposes, bf16 casts, rotate_half folding."""
    wq_t = params["wq"].T            # (HIDDEN, H*D)
    wk_t = params["wk"].T            # (HIDDEN, KV*D)
    wv_t = params["wv"].T            # (HIDDEN, KV*D)
    wo_t = params["wo"].T            # (H*D, HIDDEN)

    wq_rot = _fold_rotate_half_into_weight(wq_t, NUM_HEADS)
    wk_rot = _fold_rotate_half_into_weight(wk_t, NUM_KV_HEADS)

    w_all = jnp.concatenate([wq_t, wq_rot, wk_t, wk_rot, wv_t],
                            axis=1).astype(jnp.bfloat16)          # (128, 448)
    return {"w_all": w_all, "wo_t": wo_t.astype(jnp.bfloat16)}


def _rope_tables(seq_len, bb):
    """Lane-dense cos/sin tables (tiled over heads and batch-block); Q tables
    carry the 1/sqrt(HEAD_DIM) softmax scale."""
    inv_freq = 1.0 / (
        ROPE_THETA ** (jnp.arange(0, HEAD_DIM, 2, dtype=jnp.float32) / HEAD_DIM))
    pos = jnp.arange(seq_len, dtype=jnp.float32)
    freqs = jnp.outer(pos, inv_freq)                               # (S, D/2)
    emb = jnp.concatenate([freqs, freqs], axis=-1)                 # (S, D)
    cos, sin = jnp.cos(emb), jnp.sin(emb)
    scale = 1.0 / math.sqrt(HEAD_DIM)
    cos_q = jnp.tile(cos, (bb, NUM_HEADS)) * scale                 # (bb*S, 128)
    sin_q = jnp.tile(sin, (bb, NUM_HEADS)) * scale
    cos_k = jnp.tile(cos, (bb, NUM_KV_HEADS))                      # (bb*S, 64)
    sin_k = jnp.tile(sin, (bb, NUM_KV_HEADS))
    return cos_q, sin_q, cos_k, sin_k


def _tensorcores_per_chip():
    try:
        kind = jax.devices()[0].device_kind.lower()
    except Exception:
        return 1
    return 2 if "v7" in kind else 1


# ----------------------- wrapper -----------------------
def my_llama_attention_forward(x, prepared):
    """Pallas forward of MyLlamaAttention (no cache, no key-state reduction)."""
    b, s, hdn = x.shape

    # Single-TC chips (v5e/v6e): collapse the batch grid (one kernel step).
    # Dual-TC v7x: keep a "parallel" batch axis so both TensorCores are busy.
    n_tc = _tensorcores_per_chip()
    bb = b // n_tc if (n_tc > 1 and b % n_tc == 0) else b
    grid = (b // bb,)

    x_bf = x.astype(jnp.bfloat16)
    cos_q, sin_q, cos_k, sin_k = _rope_tables(s, bb)
    w_all, wo_t = prepared["w_all"], prepared["wo_t"]

    return pl.pallas_call(
        _fused_attention_kernel,
        out_shape=jax.ShapeDtypeStruct((b, s, hdn), jnp.float32),
        grid=grid,
        in_specs=[
            pl.BlockSpec((bb, s, hdn), lambda i: (i, 0, 0)),
            pl.BlockSpec(w_all.shape, lambda i: (0, 0)),
            pl.BlockSpec(wo_t.shape, lambda i: (0, 0)),
            pl.BlockSpec(cos_q.shape, lambda i: (0, 0)),
            pl.BlockSpec(sin_q.shape, lambda i: (0, 0)),
            pl.BlockSpec(cos_k.shape, lambda i: (0, 0)),
            pl.BlockSpec(sin_k.shape, lambda i: (0, 0)),
        ],
        out_specs=pl.BlockSpec((bb, s, hdn), lambda i: (i, 0, 0)),
        compiler_params=pltpu.CompilerParams(dimension_semantics=("parallel",)),
    )(x_bf, w_all, wo_t, cos_q, sin_q, cos_k, sin_k)


# ----------------------- pure-JAX (f32) reference -----------------------
def reference_forward(x, params):
    wq, wk, wv, wo = params["wq"], params["wk"], params["wv"], params["wo"]
    b, s, _ = x.shape
    q = (x @ wq.T).reshape(b, s, NUM_HEADS, HEAD_DIM).transpose(0, 2, 1, 3)
    k = (x @ wk.T).reshape(b, s, NUM_KV_HEADS, HEAD_DIM).transpose(0, 2, 1, 3)
    v = (x @ wv.T).reshape(b, s, NUM_KV_HEADS, HEAD_DIM).transpose(0, 2, 1, 3)

    inv_freq = 1.0 / (
        ROPE_THETA ** (jnp.arange(0, HEAD_DIM, 2, dtype=jnp.float32) / HEAD_DIM))
    pos = jnp.arange(s, dtype=jnp.float32)
    freqs = jnp.outer(pos, inv_freq)
    emb = jnp.concatenate([freqs, freqs], axis=-1)
    cos, sin = jnp.cos(emb), jnp.sin(emb)
    half = HEAD_DIM // 2

    def rope(t):
        t1, t2 = t[..., :half], t[..., half:]
        return t * cos + jnp.concatenate([-t2, t1], axis=-1) * sin

    q, k = rope(q), rope(k)
    k = jnp.repeat(k, NUM_KV_GROUPS, axis=1)
    v = jnp.repeat(v, NUM_KV_GROUPS, axis=1)

    scores = jnp.einsum("bhqd,bhkd->bhqk", q, k) / math.sqrt(HEAD_DIM)
    causal = jnp.tril(jnp.ones((s, s), dtype=bool))
    scores = jnp.where(causal, scores, jnp.finfo(jnp.float32).min)
    w = jax.nn.softmax(scores, axis=-1)
    attn = jnp.einsum("bhqk,bhkd->bhqd", w, v)
    attn = attn.transpose(0, 2, 1, 3).reshape(b, s, NUM_HEADS * HEAD_DIM)
    return attn @ wo.T


# ----------------------- main -----------------------
if __name__ == "__main__":
    key = jax.random.PRNGKey(0)
    k_x, k_q, k_k, k_v, k_o = jax.random.split(key, 5)

    # deterministic synthetic parameters, PyTorch nn.Linear layout (out, in)
    params = {
        "wq": 0.02 * jax.random.normal(k_q, (NUM_HEADS * HEAD_DIM, HIDDEN), jnp.float32),
        "wk": 0.02 * jax.random.normal(k_k, (NUM_KV_HEADS * HEAD_DIM, HIDDEN), jnp.float32),
        "wv": 0.02 * jax.random.normal(k_v, (NUM_KV_HEADS * HEAD_DIM, HIDDEN), jnp.float32),
        "wo": 0.02 * jax.random.normal(k_o, (HIDDEN, NUM_HEADS * HEAD_DIM), jnp.float32),
    }
    x = jax.random.normal(k_x, (BATCH, SEQ, HIDDEN), jnp.float32)

    prepared = prepare_attention_params(params)           # one-time weight prep
    prepared = jax.tree_util.tree_map(jax.block_until_ready, prepared)

    out = jax.jit(my_llama_attention_forward)(x, prepared)
    out = jax.block_until_ready(out)

    ref = reference_forward(x, params)
    assert out.shape == (BATCH, SEQ, HIDDEN)
    # bf16 MXU operands + approx reciprocal -> loosened tolerance vs f32 reference
    assert jnp.allclose(out, ref, atol=2e-2, rtol=2e-2), "mismatch vs reference"

    print("KERNEL_OK")
</pallas_src>

<mosaic_0001>
module attributes {stable_mosaic.version = 11 : i64} {
  func.func @_fused_attention_kernel(%arg0: i32, %arg1: memref<2x16x128xbf16, #tpu.memory_space<vmem>>, %arg2: memref<128x448xbf16, #tpu.memory_space<vmem>>, %arg3: memref<128x128xbf16, #tpu.memory_space<vmem>>, %arg4: memref<32x128xf32, #tpu.memory_space<vmem>>, %arg5: memref<32x128xf32, #tpu.memory_space<vmem>>, %arg6: memref<32x64xf32, #tpu.memory_space<vmem>>, %arg7: memref<32x64xf32, #tpu.memory_space<vmem>>, %arg8: memref<2x16x128xf32, #tpu.memory_space<vmem>>) attributes {dimension_semantics = [#tpu.dimension_semantics<parallel>], iteration_bounds = array<i64: 1>, scalar_prefetch = 0 : i64, scratch_operands = 0 : i64, tpu.core_type = #tpu.core_type<tc>, window_params = [{transform_indices = @transform_0, window_bounds = array<i64: 2, 16, 128>}, {pipeline_mode = #tpu.pipeline_mode<synchronous>, transform_indices = @transform_1, window_bounds = array<i64: 128, 448>}, {pipeline_mode = #tpu.pipeline_mode<synchronous>, transform_indices = @transform_2, window_bounds = array<i64: 128, 128>}, {pipeline_mode = #tpu.pipeline_mode<synchronous>, transform_indices = @transform_3, window_bounds = array<i64: 32, 128>}, {pipeline_mode = #tpu.pipeline_mode<synchronous>, transform_indices = @transform_4, window_bounds = array<i64: 32, 128>}, {pipeline_mode = #tpu.pipeline_mode<synchronous>, transform_indices = @transform_5, window_bounds = array<i64: 32, 64>}, {pipeline_mode = #tpu.pipeline_mode<synchronous>, transform_indices = @transform_6, window_bounds = array<i64: 32, 64>}, {transform_indices = @transform_7, window_bounds = array<i64: 2, 16, 128>}]} {
    %c0 = arith.constant 0 : index
    %c0_0 = arith.constant 0 : index
    %c0_1 = arith.constant 0 : index
    %0 = vector.load %arg1[%c0, %c0_0, %c0_1] : memref<2x16x128xbf16, #tpu.memory_space<vmem>>, vector<2x16x128xbf16>
    %1 = vector.shape_cast %0 : vector<2x16x128xbf16> to vector<32x128xbf16>
    %c0_2 = arith.constant 0 : index
    %c0_3 = arith.constant 0 : index
    %2 = vector.load %arg2[%c0_2, %c0_3] : memref<128x448xbf16, #tpu.memory_space<vmem>>, vector<128x448xbf16>
    %cst = arith.constant dense<0.000000e+00> : vector<32x448xf32>
    %3 = tpu.matmul %1, %2, %cst {dimension_numbers = #tpu.dot_dimension_numbers<[1], [0], [0], [1], [0, 0, 1, 1], [], []>} : vector<32x128xbf16>, vector<128x448xbf16>, vector<32x448xf32> -> vector<32x448xf32>
    %4 = vector.extract_strided_slice %3 {offsets = [0, 0], sizes = [32, 128], strides = [1, 1]} : vector<32x448xf32> to vector<32x128xf32>
    %5 = vector.extract_strided_slice %3 {offsets = [0, 128], sizes = [32, 128], strides = [1, 1]} : vector<32x448xf32> to vector<32x128xf32>
    %6 = vector.extract_strided_slice %3 {offsets = [0, 256], sizes = [32, 64], strides = [1, 1]} : vector<32x448xf32> to vector<32x64xf32>
    %7 = vector.extract_strided_slice %3 {offsets = [0, 320], sizes = [32, 64], strides = [1, 1]} : vector<32x448xf32> to vector<32x64xf32>
    %8 = vector.extract_strided_slice %3 {offsets = [0, 384], sizes = [32, 64], strides = [1, 1]} : vector<32x448xf32> to vector<32x64xf32>
    %c0_4 = arith.constant 0 : index
    %c0_5 = arith.constant 0 : index
    %9 = vector.load %arg4[%c0_4, %c0_5] : memref<32x128xf32, #tpu.memory_space<vmem>>, vector<32x128xf32>
    %10 = arith.mulf %4, %9 : vector<32x128xf32>
    %c0_6 = arith.constant 0 : index
    %c0_7 = arith.constant 0 : index
    %11 = vector.load %arg5[%c0_6, %c0_7] : memref<32x128xf32, #tpu.memory_space<vmem>>, vector<32x128xf32>
    %12 = arith.mulf %5, %11 : vector<32x128xf32>
    %13 = arith.addf %10, %12 : vector<32x128xf32>
    %14 = arith.truncf %13 : vector<32x128xf32> to vector<32x128xbf16>
    %c0_8 = arith.constant 0 : index
    %c0_9 = arith.constant 0 : index
    %15 = vector.load %arg6[%c0_8, %c0_9] : memref<32x64xf32, #tpu.memory_space<vmem>>, vector<32x64xf32>
    %16 = arith.mulf %6, %15 : vector<32x64xf32>
    %c0_10 = arith.constant 0 : index
    %c0_11 = arith.constant 0 : index
    %17 = vector.load %arg7[%c0_10, %c0_11] : memref<32x64xf32, #tpu.memory_space<vmem>>, vector<32x64xf32>
    %18 = arith.mulf %7, %17 : vector<32x64xf32>
    %19 = arith.addf %16, %18 : vector<32x64xf32>
    %20 = arith.truncf %19 : vector<32x64xf32> to vector<32x64xbf16>
    %21 = arith.truncf %8 : vector<32x64xf32> to vector<32x64xbf16>
    %22 = tpu.iota {dimensions = array<i32: 0>} : vector<16x16xi32>
    %23 = tpu.iota {dimensions = array<i32: 1>} : vector<16x16xi32>
    %24 = arith.cmpi sle, %23, %22 : vector<16x16xi32>
    %25 = tpu.concatenate %24, %24 in 0 : vector<16x16xi1>, vector<16x16xi1> -> vector<32x16xi1>
    %26 = vector.extract_strided_slice %14 {offsets = [0, 0], sizes = [16, 128], strides = [1, 1]} : vector<32x128xbf16> to vector<16x128xbf16>
    %27 = vector.extract_strided_slice %20 {offsets = [0, 0], sizes = [16, 64], strides = [1, 1]} : vector<32x64xbf16> to vector<16x64xbf16>
    %28 = vector.extract_strided_slice %21 {offsets = [0, 0], sizes = [16, 64], strides = [1, 1]} : vector<32x64xbf16> to vector<16x64xbf16>
    %cst_12 = arith.constant 0.000000e+00 : f32
    %29 = vector.broadcast %cst_12 : f32 to vector<16x128xf32>
    %30 = vector.extract_strided_slice %26 {offsets = [0, 0], sizes = [16, 32], strides = [1, 1]} : vector<16x128xbf16> to vector<16x32xbf16>
    %31 = vector.extract_strided_slice %26 {offsets = [0, 32], sizes = [16, 32], strides = [1, 1]} : vector<16x128xbf16> to vector<16x32xbf16>
    %32 = tpu.concatenate %30, %31 in 0 : vector<16x32xbf16>, vector<16x32xbf16> -> vector<32x32xbf16>
    %33 = vector.extract_strided_slice %27 {offsets = [0, 0], sizes = [16, 32], strides = [1, 1]} : vector<16x64xbf16> to vector<16x32xbf16>
    %34 = vector.extract_strided_slice %28 {offsets = [0, 0], sizes = [16, 32], strides = [1, 1]} : vector<16x64xbf16> to vector<16x32xbf16>
    %cst_13 = arith.constant dense<0.000000e+00> : vector<32x16xf32>
    %35 = tpu.matmul %32, %33, %cst_13 {dimension_numbers = #tpu.dot_dimension_numbers<[1], [1], [0], [0], [0, 0, 1, 0], [], []>} : vector<32x32xbf16>, vector<16x32xbf16>, vector<32x16xf32> -> vector<32x16xf32>
    %cst_14 = arith.constant -3.40282347E+38 : f32
    %36 = vector.broadcast %cst_14 : f32 to vector<32x16xf32>
    %37 = arith.select %25, %35, %36 : vector<32x16xi1>, vector<32x16xf32>
    %cst_15 = arith.constant dense<0xFF800000> : vector<32xf32>
    %38 = vector.multi_reduction <maximumf>, %37, %cst_15 [1] : vector<32x16xf32> to vector<32xf32>
    %39 = vector.shape_cast %38 : vector<32xf32> to vector<32x1xf32>
    %40 = vector.broadcast %39 : vector<32x1xf32> to vector<32x16xf32>
    %41 = arith.subf %37, %40 : vector<32x16xf32>
    %42 = math.exp %41 : vector<32x16xf32>
    %cst_16 = arith.constant dense<0.000000e+00> : vector<32xf32>
    %43 = vector.multi_reduction <add>, %42, %cst_16 [1] : vector<32x16xf32> to vector<32xf32>
    %44 = vector.shape_cast %43 : vector<32xf32> to vector<32x1xf32>
    %45 = tpu.reciprocal %44 {approx = true} : vector<32x1xf32> -> vector<32x1xf32>
    %46 = vector.broadcast %45 : vector<32x1xf32> to vector<32x16xf32>
    %47 = arith.mulf %42, %46 : vector<32x16xf32>
    %48 = arith.truncf %47 : vector<32x16xf32> to vector<32x16xbf16>
    %cst_17 = arith.constant dense<0.000000e+00> : vector<32x32xf32>
    %49 = tpu.matmul %48, %34, %cst_17 {dimension_numbers = #tpu.dot_dimension_numbers<[1], [0], [0], [1], [0, 0, 1, 1], [], []>} : vector<32x16xbf16>, vector<16x32xbf16>, vector<32x32xf32> -> vector<32x32xf32>
    %50 = vector.extract_strided_slice %49 {offsets = [0, 0], sizes = [16, 32], strides = [1, 1]} : vector<32x32xf32> to vector<16x32xf32>
    %51 = arith.truncf %50 : vector<16x32xf32> to vector<16x32xbf16>
    %c0_18 = arith.constant 0 : index
    %c0_19 = arith.constant 0 : index
    %52 = vector.load %arg3[%c0_18, %c0_19] : memref<128x128xbf16, #tpu.memory_space<vmem>>, vector<32x128xbf16>
    %cst_20 = arith.constant dense<0.000000e+00> : vector<16x128xf32>
    %53 = tpu.matmul %51, %52, %cst_20 {dimension_numbers = #tpu.dot_dimension_numbers<[1], [0], [0], [1], [0, 0, 1, 1], [], []>} : vector<16x32xbf16>, vector<32x128xbf16>, vector<16x128xf32> -> vector<16x128xf32>
    %54 = arith.addf %29, %53 : vector<16x128xf32>
    %55 = vector.extract_strided_slice %49 {offsets = [16, 0], sizes = [16, 32], strides = [1, 1]} : vector<32x32xf32> to vector<16x32xf32>
    %56 = arith.truncf %55 : vector<16x32xf32> to vector<16x32xbf16>
    %c32 = arith.constant 32 : index
    %c0_21 = arith.constant 0 : index
    %57 = vector.load %arg3[%c32, %c0_21] : memref<128x128xbf16, #tpu.memory_space<vmem>>, vector<32x128xbf16>
    %cst_22 = arith.constant dense<0.000000e+00> : vector<16x128xf32>
    %58 = tpu.matmul %56, %57, %cst_22 {dimension_numbers = #tpu.dot_dimension_numbers<[1], [0], [0], [1], [0, 0, 1, 1], [], []>} : vector<16x32xbf16>, vector<32x128xbf16>, vector<16x128xf32> -> vector<16x128xf32>
    %59 = arith.addf %54, %58 : vector<16x128xf32>
    %60 = vector.extract_strided_slice %26 {offsets = [0, 64], sizes = [16, 32], strides = [1, 1]} : vector<16x128xbf16> to vector<16x32xbf16>
    %61 = vector.extract_strided_slice %26 {offsets = [0, 96], sizes = [16, 32], strides = [1, 1]} : vector<16x128xbf16> to vector<16x32xbf16>
    %62 = tpu.concatenate %60, %61 in 0 : vector<16x32xbf16>, vector<16x32xbf16> -> vector<32x32xbf16>
    %63 = vector.extract_strided_slice %27 {offsets = [0, 32], sizes = [16, 32], strides = [1, 1]} : vector<16x64xbf16> to vector<16x32xbf16>
    %64 = vector.extract_strided_slice %28 {offsets = [0, 32], sizes = [16, 32], strides = [1, 1]} : vector<16x64xbf16> to vector<16x32xbf16>
    %cst_23 = arith.constant dense<0.000000e+00> : vector<32x16xf32>
    %65 = tpu.matmul %62, %63, %cst_23 {dimension_numbers = #tpu.dot_dimension_numbers<[1], [1], [0], [0], [0, 0, 1, 0], [], []>} : vector<32x32xbf16>, vector<16x32xbf16>, vector<32x16xf32> -> vector<32x16xf32>
    %cst_24 = arith.constant -3.40282347E+38 : f32
    %66 = vector.broadcast %cst_24 : f32 to vector<32x16xf32>
    %67 = arith.select %25, %65, %66 : vector<32x16xi1>, vector<32x16xf32>
    %cst_25 = arith.constant dense<0xFF800000> : vector<32xf32>
    %68 = vector.multi_reduction <maximumf>, %67, %cst_25 [1] : vector<32x16xf32> to vector<32xf32>
    %69 = vector.shape_cast %68 : vector<32xf32> to vector<32x1xf32>
    %70 = vector.broadcast %69 : vector<32x1xf32> to vector<32x16xf32>
    %71 = arith.subf %67, %70 : vector<32x16xf32>
    %72 = math.exp %71 : vector<32x16xf32>
    %cst_26 = arith.constant dense<0.000000e+00> : vector<32xf32>
    %73 = vector.multi_reduction <add>, %72, %cst_26 [1] : vector<32x16xf32> to vector<32xf32>
    %74 = vector.shape_cast %73 : vector<32xf32> to vector<32x1xf32>
    %75 = tpu.reciprocal %74 {approx = true} : vector<32x1xf32> -> vector<32x1xf32>
    %76 = vector.broadcast %75 : vector<32x1xf32> to vector<32x16xf32>
    %77 = arith.mulf %72, %76 : vector<32x16xf32>
    %78 = arith.truncf %77 : vector<32x16xf32> to vector<32x16xbf16>
    %cst_27 = arith.constant dense<0.000000e+00> : vector<32x32xf32>
    %79 = tpu.matmul %78, %64, %cst_27 {dimension_numbers = #tpu.dot_dimension_numbers<[1], [0], [0], [1], [0, 0, 1, 1], [], []>} : vector<32x16xbf16>, vector<16x32xbf16>, vector<32x32xf32> -> vector<32x32xf32>
    %80 = vector.extract_strided_slice %79 {offsets = [0, 0], sizes = [16, 32], strides = [1, 1]} : vector<32x32xf32> to vector<16x32xf32>
    %81 = arith.truncf %80 : vector<16x32xf32> to vector<16x32xbf16>
    %c64 = arith.constant 64 : index
    %c0_28 = arith.constant 0 : index
    %82 = vector.load %arg3[%c64, %c0_28] : memref<128x128xbf16, #tpu.memory_space<vmem>>, vector<32x128xbf16>
    %cst_29 = arith.constant dense<0.000000e+00> : vector<16x128xf32>
    %83 = tpu.matmul %81, %82, %cst_29 {dimension_numbers = #tpu.dot_dimension_numbers<[1], [0], [0], [1], [0, 0, 1, 1], [], []>} : vector<16x32xbf16>, vector<32x128xbf16>, vector<16x128xf32> -> vector<16x128xf32>
    %84 = arith.addf %59, %83 : vector<16x128xf32>
    %85 = vector.extract_strided_slice %79 {offsets = [16, 0], sizes = [16, 32], strides = [1, 1]} : vector<32x32xf32> to vector<16x32xf32>
    %86 = arith.truncf %85 : vector<16x32xf32> to vector<16x32xbf16>
    %c96 = arith.constant 96 : index
    %c0_30 = arith.constant 0 : index
    %87 = vector.load %arg3[%c96, %c0_30] : memref<128x128xbf16, #tpu.memory_space<vmem>>, vector<32x128xbf16>
    %cst_31 = arith.constant dense<0.000000e+00> : vector<16x128xf32>
    %88 = tpu.matmul %86, %87, %cst_31 {dimension_numbers = #tpu.dot_dimension_numbers<[1], [0], [0], [1], [0, 0, 1, 1], [], []>} : vector<16x32xbf16>, vector<32x128xbf16>, vector<16x128xf32> -> vector<16x128xf32>
    %89 = arith.addf %84, %88 : vector<16x128xf32>
    %c0_32 = arith.constant 0 : index
    %c0_33 = arith.constant 0 : index
    %c0_34 = arith.constant 0 : index
    %90 = vector.load %arg8[%c0_32, %c0_33, %c0_34] : memref<2x16x128xf32, #tpu.memory_space<vmem>>, vector<1x16x128xf32>
    %91 = vector.shape_cast %90 : vector<1x16x128xf32> to vector<16x128xf32>
    %92 = vector.shape_cast %89 : vector<16x128xf32> to vector<1x16x128xf32>
    tpu.vector_store %arg8[%c0_32, %c0_33, %c0_34], %92 {strides = array<i32>} : memref<2x16x128xf32, #tpu.memory_space<vmem>>, vector<1x16x128xf32>,
    %93 = vector.extract_strided_slice %14 {offsets = [16, 0], sizes = [16, 128], strides = [1, 1]} : vector<32x128xbf16> to vector<16x128xbf16>
    %94 = vector.extract_strided_slice %20 {offsets = [16, 0], sizes = [16, 64], strides = [1, 1]} : vector<32x64xbf16> to vector<16x64xbf16>
    %95 = vector.extract_strided_slice %21 {offsets = [16, 0], sizes = [16, 64], strides = [1, 1]} : vector<32x64xbf16> to vector<16x64xbf16>
    %cst_35 = arith.constant 0.000000e+00 : f32
    %96 = vector.broadcast %cst_35 : f32 to vector<16x128xf32>
    %97 = vector.extract_strided_slice %93 {offsets = [0, 0], sizes = [16, 32], strides = [1, 1]} : vector<16x128xbf16> to vector<16x32xbf16>
    %98 = vector.extract_strided_slice %93 {offsets = [0, 32], sizes = [16, 32], strides = [1, 1]} : vector<16x128xbf16> to vector<16x32xbf16>
    %99 = tpu.concatenate %97, %98 in 0 : vector<16x32xbf16>, vector<16x32xbf16> -> vector<32x32xbf16>
    %100 = vector.extract_strided_slice %94 {offsets = [0, 0], sizes = [16, 32], strides = [1, 1]} : vector<16x64xbf16> to vector<16x32xbf16>
    %101 = vector.extract_strided_slice %95 {offsets = [0, 0], sizes = [16, 32], strides = [1, 1]} : vector<16x64xbf16> to vector<16x32xbf16>
    %cst_36 = arith.constant dense<0.000000e+00> : vector<32x16xf32>
    %102 = tpu.matmul %99, %100, %cst_36 {dimension_numbers = #tpu.dot_dimension_numbers<[1], [1], [0], [0], [0, 0, 1, 0], [], []>} : vector<32x32xbf16>, vector<16x32xbf16>, vector<32x16xf32> -> vector<32x16xf32>
    %cst_37 = arith.constant -3.40282347E+38 : f32
    %103 = vector.broadcast %cst_37 : f32 to vector<32x16xf32>
    %104 = arith.select %25, %102, %103 : vector<32x16xi1>, vector<32x16xf32>
    %cst_38 = arith.constant dense<0xFF800000> : vector<32xf32>
    %105 = vector.multi_reduction <maximumf>, %104, %cst_38 [1] : vector<32x16xf32> to vector<32xf32>
    %106 = vector.shape_cast %105 : vector<32xf32> to vector<32x1xf32>
    %107 = vector.broadcast %106 : vector<32x1xf32> to vector<32x16xf32>
    %108 = arith.subf %104, %107 : vector<32x16xf32>
    %109 = math.exp %108 : vector<32x16xf32>
    %cst_39 = arith.constant dense<0.000000e+00> : vector<32xf32>
    %110 = vector.multi_reduction <add>, %109, %cst_39 [1] : vector<32x16xf32> to vector<32xf32>
    %111 = vector.shape_cast %110 : vector<32xf32> to vector<32x1xf32>
    %112 = tpu.reciprocal %111 {approx = true} : vector<32x1xf32> -> vector<32x1xf32>
    %113 = vector.broadcast %112 : vector<32x1xf32> to vector<32x16xf32>
    %114 = arith.mulf %109, %113 : vector<32x16xf32>
    %115 = arith.truncf %114 : vector<32x16xf32> to vector<32x16xbf16>
    %cst_40 = arith.constant dense<0.000000e+00> : vector<32x32xf32>
    %116 = tpu.matmul %115, %101, %cst_40 {dimension_numbers = #tpu.dot_dimension_numbers<[1], [0], [0], [1], [0, 0, 1, 1], [], []>} : vector<32x16xbf16>, vector<16x32xbf16>, vector<32x32xf32> -> vector<32x32xf32>
    %117 = vector.extract_strided_slice %116 {offsets = [0, 0], sizes = [16, 32], strides = [1, 1]} : vector<32x32xf32> to vector<16x32xf32>
    %118 = arith.truncf %117 : vector<16x32xf32> to vector<16x32xbf16>
    %c0_41 = arith.constant 0 : index
    %c0_42 = arith.constant 0 : index
    %119 = vector.load %arg3[%c0_41, %c0_42] : memref<128x128xbf16, #tpu.memory_space<vmem>>, vector<32x128xbf16>
    %cst_43 = arith.constant dense<0.000000e+00> : vector<16x128xf32>
    %120 = tpu.matmul %118, %119, %cst_43 {dimension_numbers = #tpu.dot_dimension_numbers<[1], [0], [0], [1], [0, 0, 1, 1], [], []>} : vector<16x32xbf16>, vector<32x128xbf16>, vector<16x128xf32> -> vector<16x128xf32>
    %121 = arith.addf %96, %120 : vector<16x128xf32>
    %122 = vector.extract_strided_slice %116 {offsets = [16, 0], sizes = [16, 32], strides = [1, 1]} : vector<32x32xf32> to vector<16x32xf32>
    %123 = arith.truncf %122 : vector<16x32xf32> to vector<16x32xbf16>
    %c32_44 = arith.constant 32 : index
    %c0_45 = arith.constant 0 : index
    %124 = vector.load %arg3[%c32_44, %c0_45] : memref<128x128xbf16, #tpu.memory_space<vmem>>, vector<32x128xbf16>
    %cst_46 = arith.constant dense<0.000000e+00> : vector<16x128xf32>
    %125 = tpu.matmul %123, %124, %cst_46 {dimension_numbers = #tpu.dot_dimension_numbers<[1], [0], [0], [1], [0, 0, 1, 1], [], []>} : vector<16x32xbf16>, vector<32x128xbf16>, vector<16x128xf32> -> vector<16x128xf32>
    %126 = arith.addf %121, %125 : vector<16x128xf32>
    %127 = vector.extract_strided_slice %93 {offsets = [0, 64], sizes = [16, 32], strides = [1, 1]} : vector<16x128xbf16> to vector<16x32xbf16>
    %128 = vector.extract_strided_slice %93 {offsets = [0, 96], sizes = [16, 32], strides = [1, 1]} : vector<16x128xbf16> to vector<16x32xbf16>
    %129 = tpu.concatenate %127, %128 in 0 : vector<16x32xbf16>, vector<16x32xbf16> -> vector<32x32xbf16>
    %130 = vector.extract_strided_slice %94 {offsets = [0, 32], sizes = [16, 32], strides = [1, 1]} : vector<16x64xbf16> to vector<16x32xbf16>
    %131 = vector.extract_strided_slice %95 {offsets = [0, 32], sizes = [16, 32], strides = [1, 1]} : vector<16x64xbf16> to vector<16x32xbf16>
    %cst_47 = arith.constant dense<0.000000e+00> : vector<32x16xf32>
    %132 = tpu.matmul %129, %130, %cst_47 {dimension_numbers = #tpu.dot_dimension_numbers<[1], [1], [0], [0], [0, 0, 1, 0], [], []>} : vector<32x32xbf16>, vector<16x32xbf16>, vector<32x16xf32> -> vector<32x16xf32>
    %cst_48 = arith.constant -3.40282347E+38 : f32
    %133 = vector.broadcast %cst_48 : f32 to vector<32x16xf32>
    %134 = arith.select %25, %132, %133 : vector<32x16xi1>, vector<32x16xf32>
    %cst_49 = arith.constant dense<0xFF800000> : vector<32xf32>
    %135 = vector.multi_reduction <maximumf>, %134, %cst_49 [1] : vector<32x16xf32> to vector<32xf32>
    %136 = vector.shape_cast %135 : vector<32xf32> to vector<32x1xf32>
    %137 = vector.broadcast %136 : vector<32x1xf32> to vector<32x16xf32>
    %138 = arith.subf %134, %137 : vector<32x16xf32>
    %139 = math.exp %138 : vector<32x16xf32>
    %cst_50 = arith.constant dense<0.000000e+00> : vector<32xf32>
    %140 = vector.multi_reduction <add>, %139, %cst_50 [1] : vector<32x16xf32> to vector<32xf32>
    %141 = vector.shape_cast %140 : vector<32xf32> to vector<32x1xf32>
    %142 = tpu.reciprocal %141 {approx = true} : vector<32x1xf32> -> vector<32x1xf32>
    %143 = vector.broadcast %142 : vector<32x1xf32> to vector<32x16xf32>
    %144 = arith.mulf %139, %143 : vector<32x16xf32>
    %145 = arith.truncf %144 : vector<32x16xf32> to vector<32x16xbf16>
    %cst_51 = arith.constant dense<0.000000e+00> : vector<32x32xf32>
    %146 = tpu.matmul %145, %131, %cst_51 {dimension_numbers = #tpu.dot_dimension_numbers<[1], [0], [0], [1], [0, 0, 1, 1], [], []>} : vector<32x16xbf16>, vector<16x32xbf16>, vector<32x32xf32> -> vector<32x32xf32>
    %147 = vector.extract_strided_slice %146 {offsets = [0, 0], sizes = [16, 32], strides = [1, 1]} : vector<32x32xf32> to vector<16x32xf32>
    %148 = arith.truncf %147 : vector<16x32xf32> to vector<16x32xbf16>
    %c64_52 = arith.constant 64 : index
    %c0_53 = arith.constant 0 : index
    %149 = vector.load %arg3[%c64_52, %c0_53] : memref<128x128xbf16, #tpu.memory_space<vmem>>, vector<32x128xbf16>
    %cst_54 = arith.constant dense<0.000000e+00> : vector<16x128xf32>
    %150 = tpu.matmul %148, %149, %cst_54 {dimension_numbers = #tpu.dot_dimension_numbers<[1], [0], [0], [1], [0, 0, 1, 1], [], []>} : vector<16x32xbf16>, vector<32x128xbf16>, vector<16x128xf32> -> vector<16x128xf32>
    %151 = arith.addf %126, %150 : vector<16x128xf32>
    %152 = vector.extract_strided_slice %146 {offsets = [16, 0], sizes = [16, 32], strides = [1, 1]} : vector<32x32xf32> to vector<16x32xf32>
    %153 = arith.truncf %152 : vector<16x32xf32> to vector<16x32xbf16>
    %c96_55 = arith.constant 96 : index
    %c0_56 = arith.constant 0 : index
    %154 = vector.load %arg3[%c96_55, %c0_56] : memref<128x128xbf16, #tpu.memory_space<vmem>>, vector<32x128xbf16>
    %cst_57 = arith.constant dense<0.000000e+00> : vector<16x128xf32>
    %155 = tpu.matmul %153, %154, %cst_57 {dimension_numbers = #tpu.dot_dimension_numbers<[1], [0], [0], [1], [0, 0, 1, 1], [], []>} : vector<16x32xbf16>, vector<32x128xbf16>, vector<16x128xf32> -> vector<16x128xf32>
    %156 = arith.addf %151, %155 : vector<16x128xf32>
    %c1 = arith.constant 1 : index
    %c0_58 = arith.constant 0 : index
    %c0_59 = arith.constant 0 : index
    %157 = vector.load %arg8[%c1, %c0_58, %c0_59] : memref<2x16x128xf32, #tpu.memory_space<vmem>>, vector<1x16x128xf32>
    %158 = vector.shape_cast %157 : vector<1x16x128xf32> to vector<16x128xf32>
    %159 = vector.shape_cast %156 : vector<16x128xf32> to vector<1x16x128xf32>
    tpu.vector_store %arg8[%c1, %c0_58, %c0_59], %159 {strides = array<i32>} : memref<2x16x128xf32, #tpu.memory_space<vmem>>, vector<1x16x128xf32>,
    return
  }
  func.func @transform_0(%arg0: i32) -> (i32, i32, i32) {
    %c0_i32 = arith.constant 0 : i32
    %c0_i32_0 = arith.constant 0 : i32
    %c0_i32_1 = arith.constant 0 : i32
    return %arg0, %c0_i32, %c0_i32_0 : i32, i32, i32
  }
  func.func @transform_1(%arg0: i32) -> (i32, i32) {
    %c0_i32 = arith.constant 0 : i32
    %c0_i32_0 = arith.constant 0 : i32
    %c0_i32_1 = arith.constant 0 : i32
    return %c0_i32, %c0_i32_0 : i32, i32
  }
  func.func @transform_2(%arg0: i32) -> (i32, i32) {
    %c0_i32 = arith.constant 0 : i32
    %c0_i32_0 = arith.constant 0 : i32
    %c0_i32_1 = arith.constant 0 : i32
    return %c0_i32, %c0_i32_0 : i32, i32
  }
  func.func @transform_3(%arg0: i32) -> (i32, i32) {
    %c0_i32 = arith.constant 0 : i32
    %c0_i32_0 = arith.constant 0 : i32
    %c0_i32_1 = arith.constant 0 : i32
    return %c0_i32, %c0_i32_0 : i32, i32
  }
  func.func @transform_4(%arg0: i32) -> (i32, i32) {
    %c0_i32 = arith.constant 0 : i32
    %c0_i32_0 = arith.constant 0 : i32
    %c0_i32_1 = arith.constant 0 : i32
    return %c0_i32, %c0_i32_0 : i32, i32
  }
  func.func @transform_5(%arg0: i32) -> (i32, i32) {
    %c0_i32 = arith.constant 0 : i32
    %c0_i32_0 = arith.constant 0 : i32
    %c0_i32_1 = arith.constant 0 : i32
    return %c0_i32, %c0_i32_0 : i32, i32
  }
  func.func @transform_6(%arg0: i32) -> (i32, i32) {
    %c0_i32 = arith.constant 0 : i32
    %c0_i32_0 = arith.constant 0 : i32
    %c0_i32_1 = arith.constant 0 : i32
    return %c0_i32, %c0_i32_0 : i32, i32
  }
  func.func @transform_7(%arg0: i32) -> (i32, i32, i32) {
    %c0_i32 = arith.constant 0 : i32
    %c0_i32_0 = arith.constant 0 : i32
    %c0_i32_1 = arith.constant 0 : i32
    return %arg0, %c0_i32, %c0_i32_0 : i32, i32, i32
  }
}

</mosaic_0001>

<bundles_post_ra>
// kernel: tile.38
= control target key start
LH: loop header
LB: loop body
LE: loop exit
PB: predicated region body
PF: predicated region fallthrough
CT: control target
= control target key end

     0   :  { %s312_s0 = inlined_call_operand.vmem [shape: f32[16,32], index: 0, kind: input, shape index: {}]   ;;  %s313_s1 = inlined_call_operand.vmem [shape: f32[2,16,2,32], index: 1, kind: output, shape index: {}]  }
   0x1   :  { %v4_v0 = vld [vmem:[%s312_s0] ss:$0 sm:$0xff]  ;;  %v113_v1 = vld [vmem:[%s312_s0 + $0x1] ss:$0 sm:$0xff]  ;;  %v116_v2 = vld [vmem:[%s312_s0 + $0x2] ss:$0 sm:$0xff] }
   0x2   :  { %5 = vst [vmem:[%s313_s1] sm:$0x3] %v4_v0  ;;  %112 = vst [vmem:[%s313_s1 + $0x20] sm:$0x3] %v4_v0  ;;  %v119_v3 = vld [vmem:[%s312_s0 + $0x3] ss:$0 sm:$0xff] }
   0x3   :  { %114 = vst [vmem:[%s313_s1 + $0x2] sm:$0x3] %v113_v1  ;;  %115 = vst [vmem:[%s313_s1 + $0x22] sm:$0x3] %v113_v1  ;;  %v122_v4 = vld [vmem:[%s312_s0 + $0x4] ss:$0 sm:$0xff] }
   0x4   :  { %117 = vst [vmem:[%s313_s1 + $0x4] sm:$0x3] %v116_v2  ;;  %118 = vst [vmem:[%s313_s1 + $0x24] sm:$0x3] %v116_v2  ;;  %v125_v5 = vld [vmem:[%s312_s0 + $0x5] ss:$0 sm:$0xff] }
   0x5   :  { %120 = vst [vmem:[%s313_s1 + $0x6] sm:$0x3] %v119_v3  ;;  %121 = vst [vmem:[%s313_s1 + $0x26] sm:$0x3] %v119_v3  ;;  %v128_v6 = vld [vmem:[%s312_s0 + $0x6] ss:$0 sm:$0xff] }
   0x6   :  { %123 = vst [vmem:[%s313_s1 + $0x8] sm:$0x3] %v122_v4  ;;  %124 = vst [vmem:[%s313_s1 + $0x28] sm:$0x3] %v122_v4  ;;  %v131_v7 = vld [vmem:[%s312_s0 + $0x7] ss:$0 sm:$0xff] }
   0x7   :  { %126 = vst [vmem:[%s313_s1 + $0xa] sm:$0x3] %v125_v5  ;;  %127 = vst [vmem:[%s313_s1 + $0x2a] sm:$0x3] %v125_v5  ;;  %v134_v8 = vld [vmem:[%s312_s0 + $0x8] ss:$0 sm:$0xff] }
   0x8   :  { %129 = vst [vmem:[%s313_s1 + $0xc] sm:$0x3] %v128_v6  ;;  %130 = vst [vmem:[%s313_s1 + $0x2c] sm:$0x3] %v128_v6  ;;  %v137_v9 = vld [vmem:[%s312_s0 + $0x9] ss:$0 sm:$0xff] }
   0x9   :  { %132 = vst [vmem:[%s313_s1 + $0xe] sm:$0x3] %v131_v7  ;;  %133 = vst [vmem:[%s313_s1 + $0x2e] sm:$0x3] %v131_v7  ;;  %v140_v10 = vld [vmem:[%s312_s0 + $0xa] ss:$0 sm:$0xff] }
   0xa   :  { %135 = vst [vmem:[%s313_s1 + $0x10] sm:$0x3] %v134_v8  ;;  %136 = vst [vmem:[%s313_s1 + $0x30] sm:$0x3] %v134_v8  ;;  %v143_v11 = vld [vmem:[%s312_s0 + $0xb] ss:$0 sm:$0xff] }
   0xb   :  { %138 = vst [vmem:[%s313_s1 + $0x12] sm:$0x3] %v137_v9  ;;  %139 = vst [vmem:[%s313_s1 + $0x32] sm:$0x3] %v137_v9  ;;  %v146_v12 = vld [vmem:[%s312_s0 + $0xc] ss:$0 sm:$0xff] }
   0xc   :  { %141 = vst [vmem:[%s313_s1 + $0x14] sm:$0x3] %v140_v10  ;;  %142 = vst [vmem:[%s313_s1 + $0x34] sm:$0x3] %v140_v10  ;;  %v149_v13 = vld [vmem:[%s312_s0 + $0xd] ss:$0 sm:$0xff] }
   0xd   :  { %144 = vst [vmem:[%s313_s1 + $0x16] sm:$0x3] %v143_v11  ;;  %145 = vst [vmem:[%s313_s1 + $0x36] sm:$0x3] %v143_v11  ;;  %v152_v14 = vld [vmem:[%s312_s0 + $0xe] ss:$0 sm:$0xff] }
   0xe   :  { %147 = vst [vmem:[%s313_s1 + $0x18] sm:$0x3] %v146_v12  ;;  %148 = vst [vmem:[%s313_s1 + $0x38] sm:$0x3] %v146_v12  ;;  %v155_v15 = vld [vmem:[%s312_s0 + $0xf] ss:$0 sm:$0xff] }
   0xf   :  { %150 = vst [vmem:[%s313_s1 + $0x1a] sm:$0x3] %v149_v13  ;;  %151 = vst [vmem:[%s313_s1 + $0x3a] sm:$0x3] %v149_v13 }
  0x10   :  { %153 = vst [vmem:[%s313_s1 + $0x1c] sm:$0x3] %v152_v14  ;;  %154 = vst [vmem:[%s313_s1 + $0x3c] sm:$0x3] %v152_v14 }
  0x11   :  { %156 = vst [vmem:[%s313_s1 + $0x1e] sm:$0x3] %v155_v15  ;;  %157 = vst [vmem:[%s313_s1 + $0x3e] sm:$0x3] %v155_v15 }

// kernel: tile.39
= control target key start
LH: loop header
LB: loop body
LE: loop exit
PB: predicated region body
PF: predicated region fallthrough
CT: control target
= control target key end

     0   :  { %vm162_vm0 = vcmask 1047556   ;;  %s304_s10 = smov 32   ;;  %vm164_vm1 = vcmask 261120   ;;  %vm201_vm2 = vcmask 523520   ;;  %s451_s0 = inlined_call_operand.vmem [shape: f32[2,16,2,32], index: 0, kind: input, shape index: {}]   ;;  %s452_s1 = inlined_call_operand.vmem [shape: f32[32,64], index: 1, kind: output, shape index: {}]  }
   0x1   :  { %v290_v0 = vld [vmem:[%s451_s0 + $0xe] sm:$0x3]  ;;  %v291_v1 = vld [vmem:[%s451_s0 + $0xc] sm:$0x3]  ;;  %v292_v2 = vld [vmem:[%s451_s0 + $0xa] sm:$0x3] }
   0x2   :  { %128 = vst [vmem:[#allocation0 + $0x38] sm:$0x3] %v290_v0  ;;  %133 = vst [vmem:[#allocation0 + $0x30] sm:$0x3] %v291_v1  ;;  %v293_v3 = vld [vmem:[%s451_s0 + $0x8] sm:$0x3] }
   0x3   :  { %138 = vst [vmem:[#allocation0 + $0x28] sm:$0x3] %v292_v2  ;;  %v294_v4 = vld [vmem:[%s451_s0 + $0x6] sm:$0x3]  ;;  %v295_v5 = vld [vmem:[%s451_s0 + $0x4] sm:$0x3] }
   0x4   :  { %143 = vst [vmem:[#allocation0 + $0x20] sm:$0x3] %v293_v3  ;;  %148 = vst [vmem:[#allocation0 + $0x18] sm:$0x3] %v294_v4  ;;  %v296_v6 = vld [vmem:[%s451_s0 + $0x2] sm:$0x3] }
   0x5   :  { %153 = vst [vmem:[#allocation0 + $0x10] sm:$0x3] %v295_v5  ;;  %v158_v7 = vld [vmem:[%s451_s0] sm:$0x3]  ;;  %157 = vst [vmem:[#allocation0 + $0x8] sm:$0x3] %v296_v6 }
   0x6   :  { %159 = vst [vmem:[#allocation0] sm:$0x3] %v158_v7  ;;  %v274_v8 = vld [vmem:[%s451_s0 + $0x2e] sm:$0x3]  ;;  %v275_v9 = vld [vmem:[%s451_s0 + $0x2c] sm:$0x3] }
   0x7   :  { %v276_v10 = vld [vmem:[%s451_s0 + $0x2a] sm:$0x3]  ;;  %48 = vst [vmem:[#allocation0 + $0xb8] sm:$0x3] %v274_v8  ;;  %53 = vst [vmem:[#allocation0 + $0xb0] sm:$0x3] %v275_v9 }
   0x8   :  { %58 = vst [vmem:[#allocation0 + $0xa8] sm:$0x3] %v276_v10  ;;  %v277_v11 = vld [vmem:[%s451_s0 + $0x28] sm:$0x3]  ;;  %v278_v12 = vld [vmem:[%s451_s0 + $0x26] sm:$0x3] }
   0x9   :  { %v279_v13 = vld [vmem:[%s451_s0 + $0x24] sm:$0x3]  ;;  %63 = vst [vmem:[#allocation0 + $0xa0] sm:$0x3] %v277_v11  ;;  %68 = vst [vmem:[#allocation0 + $0x98] sm:$0x3] %v278_v12 }
   0xa   :  { %73 = vst [vmem:[#allocation0 + $0x90] sm:$0x3] %v279_v13  ;;  %v280_v14 = vld [vmem:[%s451_s0 + $0x22] sm:$0x3]  ;;  %v281_v15 = vld [vmem:[%s451_s0 + $0x20] sm:$0x3] }
   0xb   :  { %v282_v16 = vld [vmem:[%s451_s0 + $0x1e] sm:$0x3]  ;;  %78 = vst [vmem:[#allocation0 + $0x88] sm:$0x3] %v280_v14  ;;  %83 = vst [vmem:[#allocation0 + $0x80] sm:$0x3] %v281_v15 }
   0xc   :  { %88 = vst [vmem:[#allocation0 + $0x78] sm:$0x3] %v282_v16  ;;  %v283_v17 = vld [vmem:[%s451_s0 + $0x1c] sm:$0x3]  ;;  %v284_v18 = vld [vmem:[%s451_s0 + $0x1a] sm:$0x3] }
   0xd   :  { %v285_v19 = vld [vmem:[%s451_s0 + $0x18] sm:$0x3]  ;;  %93 = vst [vmem:[#allocation0 + $0x70] sm:$0x3] %v283_v17  ;;  %98 = vst [vmem:[#allocation0 + $0x68] sm:$0x3] %v284_v18 }
   0xe   :  { %103 = vst [vmem:[#allocation0 + $0x60] sm:$0x3] %v285_v19  ;;  %v286_v20 = vld [vmem:[%s451_s0 + $0x16] sm:$0x3]  ;;  %v287_v21 = vld [vmem:[%s451_s0 + $0x14] sm:$0x3] }
   0xf   :  { %v288_v22 = vld [vmem:[%s451_s0 + $0x12] sm:$0x3]  ;;  %108 = vst [vmem:[#allocation0 + $0x58] sm:$0x3] %v286_v20  ;;  %113 = vst [vmem:[#allocation0 + $0x50] sm:$0x3] %v287_v21 }
  0x10   :  { %118 = vst [vmem:[#allocation0 + $0x48] sm:$0x3] %v288_v22  ;;  %v289_v23 = vld [vmem:[%s451_s0 + $0x10] sm:$0x3]  ;;  %v266_v24 = vld [vmem:[%s451_s0 + $0x3e] sm:$0x3] }
  0x11   :  { %v267_v25 = vld [vmem:[%s451_s0 + $0x3c] sm:$0x3]  ;;  %v196_v26 = vld [vmem:[#allocation0 + $0x1] ss:$8 sm:$0xf0]  }
  0x12   :  { %123 = vst [vmem:[#allocation0 + $0x40] sm:$0x3] %v289_v23  ;;  %8 = vst [vmem:[#allocation0 + $0xf8] sm:$0x3] %v266_v24  ;;  %v268_v27 = vld [vmem:[%s451_s0 + $0x3a] sm:$0x3] }
  0x13   :  { %13 = vst [vmem:[#allocation0 + $0xf0] sm:$0x3] %v267_v25  ;;  %v194_v28 = vld [vmem:[#allocation0 + $0x1] ss:$8 sm:$0xf]  }
  0x14   :  { %18 = vst [vmem:[#allocation0 + $0xe8] sm:$0x3] %v268_v27  ;;  %v269_v29 = vld [vmem:[%s451_s0 + $0x38] sm:$0x3]  ;;  %v198_v30 = vsel %vm162_vm0, %v196_v26, %v194_v28  ;;  %v270_v31 = vld [vmem:[%s451_s0 + $0x36] sm:$0x3] }
  0x15   :  { %23 = vst [vmem:[#allocation0 + $0xe0] sm:$0x3] %v269_v29  ;;  %v271_v32 = vld [vmem:[%s451_s0 + $0x34] sm:$0x3]  ;;  %v272_v33 = vld [vmem:[%s451_s0 + $0x32] sm:$0x3]  ;;  %199 = vrot.lane.b32.xlu0 %v198_v30, %s304_s10 }
  0x16   :  { %v217_v34 = vld [vmem:[#allocation0 + $0x81] ss:$8 sm:$0xf0]   ;;  %28 = vst [vmem:[#allocation0 + $0xd8] sm:$0x3] %v270_v31 }
  0x17   :  { %33 = vst [vmem:[#allocation0 + $0xd0] sm:$0x3] %v271_v32  ;;  %38 = vst [vmem:[#allocation0 + $0xc8] sm:$0x3] %v272_v33  ;;  %v273_v35 = vld [vmem:[%s451_s0 + $0x30] sm:$0x3] }
  0x18   :  { %v215_v36 = vld [vmem:[#allocation0 + $0x81] ss:$8 sm:$0xf]   ;;  %43 = vst [vmem:[#allocation0 + $0xc0] sm:$0x3] %v273_v35 }
  0x19   :  { %v160_v37 = vld [vmem:[#allocation0] ss:$8 sm:$0xf]   ;;  %v219_v38 = vsel %vm162_vm0, %v217_v34, %v215_v36  ;;  %v206_v39 = vld [vmem:[#allocation0 + $0x41] ss:$8 sm:$0xf0]  }
  0x1a   :  { %v161_v40 = vld [vmem:[#allocation0] ss:$8 sm:$0xf0]   ;;  %220 = vrot.lane.b32.xlu1 %v219_v38, %s304_s10  ;;  %v204_v44 = vld [vmem:[#allocation0 + $0x41] ss:$8 sm:$0xf]  }
  0x1b   :  { %v163_v41 = vsel %vm162_vm0, %v161_v40, %v160_v37  ;;  %v176_v42 = vld [vmem:[#allocation0 + $0x80] ss:$8 sm:$0xf]   ;;  %v208_v47 = vsel %vm162_vm0, %v206_v39, %v204_v44 }
  0x1c   :  { %v178_v43 = vld [vmem:[#allocation0 + $0x80] ss:$8 sm:$0xf0]   ;;  %165 = vst.msk [vmem:[%s452_s1] sm:$0xff] %vm164_vm1, %v163_v41   ;;  %209 = vrot.lane.b32.xlu0 %v208_v47, %s304_s10 }
  0x1d   :  { %v180_v45 = vsel %vm162_vm0, %v178_v43, %v176_v42  ;;  %v167_v46 = vld [vmem:[#allocation0 + $0x40] ss:$8 sm:$0xf]   ;;  %v228_v49 = vld [vmem:[#allocation0 + $0xc1] ss:$8 sm:$0xf0]  }
  0x1e   :  { %298 = vst.msk [vmem:[%s452_s1 + $0x10] sm:$0xff] %vm164_vm1, %v180_v45   ;;  %v169_v48 = vld [vmem:[#allocation0 + $0x40] ss:$8 sm:$0xf0]  }
  0x1f   :  { %v171_v50 = vsel %vm162_vm0, %v169_v48, %v167_v46  ;;  %v187_v51 = vld [vmem:[#allocation0 + $0xc0] ss:$8 sm:$0xf0]   ;;  %v226_v52 = vld [vmem:[#allocation0 + $0xc1] ss:$8 sm:$0xf]  }
  0x20   :  { %297 = vst.msk [vmem:[%s452_s1 + $0x8] sm:$0xff] %vm164_vm1, %v171_v50   ;;  %v185_v53 = vld [vmem:[#allocation0 + $0xc0] ss:$8 sm:$0xf]   ;;  %v230_v54 = vsel %vm162_vm0, %v228_v49, %v226_v52 }
  0x21   :  { %v189_v55 = vsel %vm162_vm0, %v187_v51, %v185_v53  ;;  %231 = vrot.lane.b32.xlu1 %v230_v54, %s304_s10 }
  0x22   :  { %299 = vst.msk [vmem:[%s452_s1 + $0x18] sm:$0xff] %vm164_vm1, %v189_v55  }
  0x87   :  { %v200_v56 = vpop.permute.xlu0 %199  }
  0x88   :  { %202 = vst.msk [vmem:[%s452_s1] sm:$0xff] %vm201_vm2, %v200_v56  }
  0x8c   :  { %v221_v57 = vpop.permute.xlu1 %220  }
  0x8d   :  { %301 = vst.msk [vmem:[%s452_s1 + $0x10] sm:$0xff] %vm201_vm2, %v221_v57  }
  0x8e   :  { %v210_v58 = vpop.permute.xlu0 %209  }
  0x8f   :  { %300 = vst.msk [vmem:[%s452_s1 + $0x8] sm:$0xff] %vm201_vm2, %v210_v58  }
  0x93   :  { %v232_v59 = vpop.permute.xlu1 %231  }
  0x94   :  { %302 = vst.msk [vmem:[%s452_s1 + $0x18] sm:$0xff] %vm201_vm2, %v232_v59  }

// kernel: my_llama_attention_forward.1
= control target key start
LH: loop header
LB: loop body
LE: loop exit
PB: predicated region body
PF: predicated region fallthrough
CT: control target
= control target key end

     0   :  { %v2050_v2 = vmov 0   ;;  %s2051_s19 = smov 64   ;;  %s2503_s0 = inlined_call_operand.vmem [shape: bf16[2,16,128], index: 0, kind: input, shape index: {}]   ;;  %s2504_s1 = inlined_call_operand.vmem [shape: bf16[128,448], index: 1, kind: input, shape index: {}]   ;;  %s2505_s2 = inlined_call_operand.vmem [shape: bf16[128,128], index: 2, kind: input, shape index: {}]   ;;  %s2506_s3 = inlined_call_operand.vmem [shape: f32[32,128], index: 3, kind: input, shape index: {}]   ;;  %s2507_s4 = inlined_call_operand.vmem [shape: f32[32,128], index: 4, kind: input, shape index: {}]   ;;  %s2508_s5 = inlined_call_operand.vmem [shape: f32[32,64], index: 5, kind: input, shape index: {}]   ;;  %s2509_s6 = inlined_call_operand.vmem [shape: f32[32,64], index: 6, kind: input, shape index: {}]   ;;  %s2510_s7 = inlined_call_operand.hbm [shape: f32[2,16,128], index: 7, kind: output, shape index: {}]  }
   0x1   :  { %v1896_v0 = vld [vmem:[%s2504_s1 + $0xc] ss:$16 sps:$4 sm:$0xff]   ;;  %v1898_v1 = vld [vmem:[%s2504_s1 + $0x8] ss:$16 sps:$4 sm:$0xff]   ;;  %321 = vmatprep.mubr.bf16.mxu1 %v2050_v2  ;;  %268 = vmatprep.mubr.bf16.mxu0 %v2050_v2  ;;  %v1904_v6 = vld [vmem:[%s2504_s1 + $0x4] ss:$16 sps:$4 sm:$0xff]  }
   0x2   :  { %289 = vmatprep.subr.bf16.mxu1 %v1896_v0  ;;  %v1899_v3 = vld [vmem:[%s2504_s1 + $0x2c] ss:$16 sps:$4 sm:$0xff]   ;;  %v1901_v4 = vld [vmem:[%s2504_s1 + $0x28] ss:$16 sps:$4 sm:$0xff]   ;;  %v1907_v7 = vld [vmem:[%s2504_s1] ss:$16 sps:$4 sm:$0xff]   ;;  %236 = vmatprep.subr.bf16.mxu0 %v1904_v6 }
   0x3   :  { %290 = vmatpush1.bf16.msra.mxu1 %v1898_v1  ;;  %v1902_v5 = vld [vmem:[%s2504_s1 + $0x4c] ss:$16 sps:$4 sm:$0xff]   ;;  %v1906_v8 = vld [vmem:[%s2504_s1 + $0x48] ss:$16 sps:$4 sm:$0xff]   ;;  %237 = vmatpush1.bf16.msra.mxu0 %v1907_v7  ;;  %v1910_v9 = vld [vmem:[%s2504_s1 + $0x24] ss:$16 sps:$4 sm:$0xff]  }
   0x4   :  { %291 = vmatprep.subr.bf16.mxu1 %v1899_v3  ;;  %v1913_v10 = vld [vmem:[%s2504_s1 + $0x20] ss:$16 sps:$4 sm:$0xff]   ;;  %v1908_v11 = vld [vmem:[%s2504_s1 + $0x6c] ss:$16 sps:$4 sm:$0xff]   ;;  %238 = vmatprep.subr.bf16.mxu0 %v1910_v9  ;;  %v1916_v12 = vld [vmem:[%s2504_s1 + $0x44] ss:$16 sps:$4 sm:$0xff]  }
   0x5   :  { %v1912_v13 = vld [vmem:[%s2504_s1 + $0x68] ss:$16 sps:$4 sm:$0xff]   ;;  %v1919_v14 = vld [vmem:[%s2504_s1 + $0x40] ss:$16 sps:$4 sm:$0xff]   ;;  %v1914_v15 = vld [vmem:[%s2504_s1 + $0x8c] ss:$16 sps:$4 sm:$0xff]  }
   0x6   :  { %v1922_v16 = vld [vmem:[%s2504_s1 + $0x64] ss:$16 sps:$4 sm:$0xff]   ;;  %v1918_v17 = vld [vmem:[%s2504_s1 + $0x88] ss:$16 sps:$4 sm:$0xff]   ;;  %v1920_v18 = vld [vmem:[%s2504_s1 + $0xac] ss:$16 sps:$4 sm:$0xff]  }
   0x7   :  { %292 = vmatpush1.bf16.msra.mxu1 %v1901_v4  ;;  %239 = vmatpush1.bf16.msra.mxu0 %v1913_v10  ;;  %v1925_v19 = vld [vmem:[%s2504_s1 + $0x60] ss:$16 sps:$4 sm:$0xff]   ;;  %v1928_v20 = vld [vmem:[%s2504_s1 + $0x84] ss:$16 sps:$4 sm:$0xff]   ;;  %v1924_v21 = vld [vmem:[%s2504_s1 + $0xa8] ss:$16 sps:$4 sm:$0xff]  }
   0x8   :  { %293 = vmatprep.subr.bf16.mxu1 %v1902_v5  ;;  %240 = vmatprep.subr.bf16.mxu0 %v1916_v12  ;;  %v1931_v22 = vld [vmem:[%s2504_s1 + $0x80] ss:$16 sps:$4 sm:$0xff]   ;;  %v1926_v23 = vld [vmem:[%s2504_s1 + $0xcc] ss:$16 sps:$4 sm:$0xff]   ;;  %v1934_v24 = vld [vmem:[%s2504_s1 + $0xa4] ss:$16 sps:$4 sm:$0xff]  }
   0x9   :  { %v1930_v25 = vld [vmem:[%s2504_s1 + $0xc8] ss:$16 sps:$4 sm:$0xff]   ;;  %v1932_v26 = vld [vmem:[%s2504_s1 + $0xec] ss:$16 sps:$4 sm:$0xff]   ;;  %v1937_v27 = vld [vmem:[%s2504_s1 + $0xa0] ss:$16 sps:$4 sm:$0xff]  }
   0xa   :  { %v1939_v28 = vld [vmem:[%s2504_s1 + $0xc4] ss:$16 sps:$4 sm:$0xff]   ;;  %v373_v30 = vld [vmem:[%s2509_s6 + $0x8] sm:$0xff]  ;;  %v1941_v32 = vld [vmem:[%s2504_s1 + $0xc0] ss:$16 sps:$4 sm:$0xff]  }
   0xb   :  { %294 = vmatpush1.bf16.msra.mxu1 %v1906_v8  ;;  %241 = vmatpush1.bf16.msra.mxu0 %v1919_v14  ;;  %v372_v29 = vld [vmem:[%s2509_s6] sm:$0xff]  ;;  %v1936_v31 = vld [vmem:[%s2504_s1 + $0xe8] ss:$16 sps:$4 sm:$0xff]  }
   0xc   :  { %295 = vmatprep.subr.bf16.mxu1 %v1908_v11  ;;  %242 = vmatprep.subr.bf16.mxu0 %v1922_v16  ;;  %v1942_v33 = vld [vmem:[%s2504_s1 + $0xe4] ss:$16 sps:$4 sm:$0xff]   ;;  %v1944_v35 = vld [vmem:[%s2504_s1 + $0xe0] ss:$16 sps:$4 sm:$0xff]  }
   0xd   :  { %380 = vrot.lane.b32.xlu0 %v372_v29, %s2051_s19  ;;  %v1938_v34 = vld [vmem:[%s2503_s0] sm:$0xff]  }
   0xf   :  { %296 = vmatpush1.bf16.msra.mxu1 %v1912_v13  ;;  %243 = vmatpush1.bf16.msra.mxu0 %v1925_v19 }
  0x10   :  { %297 = vmatprep.subr.bf16.mxu1 %v1914_v15  ;;  %244 = vmatprep.subr.bf16.mxu0 %v1928_v20 }
  0x11   :  { %382 = vrot.lane.b32.xlu0 %v373_v30, %s2051_s19 }
  0x13   :  { %298 = vmatpush1.bf16.msra.mxu1 %v1918_v17  ;;  %245 = vmatpush1.bf16.msra.mxu0 %v1931_v22 }
  0x14   :  { %299 = vmatprep.subr.bf16.mxu1 %v1920_v18  ;;  %246 = vmatprep.subr.bf16.mxu0 %v1934_v24 }
  0x17   :  { %300 = vmatpush1.bf16.msra.mxu1 %v1924_v21  ;;  %247 = vmatpush1.bf16.msra.mxu0 %v1937_v27 }
  0x18   :  { %301 = vmatprep.subr.bf16.mxu1 %v1926_v23  ;;  %248 = vmatprep.subr.bf16.mxu0 %v1939_v28 }
  0x1b   :  { %302 = vmatpush1.bf16.msra.mxu1 %v1930_v25  ;;  %249 = vmatpush1.bf16.msra.mxu0 %v1941_v32 }
  0x1c   :  { %303 = vmatprep.subr.bf16.mxu1 %v1932_v26  ;;  %250 = vmatprep.subr.bf16.mxu0 %v1942_v33 }
  0x1f   :  { %304 = vmatpush1.bf16.msra.mxu1 %v1936_v31 }
  0x22   :  { %322 = vmatmul.mubr.bf16.vlgmr.msra.gmra.mrb[0].mxu1 %v1938_v34 }
  0x23   :  { %12 = vsyncpa [#allocation3], 0  ;;  %251 = vmatpush1.bf16.msra.mxu0 %v1944_v35  ;;  %331 = vmatprep.mubr.bf16.mxu1 %v2050_v2  ;;  %v1945_v36 = vld [vmem:[%s2503_s0 + $0x8] sm:$0xff]   ;;  %v342_v43 = vld [vmem:[%s2506_s3] sm:$0xff]  ;;  %vm430_vm0 = vcmask 261120   ;;  %s2052_s11 = smov 96   ;;  %v420_v13 = vlaneseq }
  0x24   :  { %v350_v45 = vld [vmem:[%s2507_s4] sm:$0xff]  ;;  %v343_v48 = vld [vmem:[%s2506_s3 + $0x8] sm:$0xff]  ;;  %vm493_vm2 = vcmask 130048   ;;  %vm2054_vm4 = vmmov 0   ;;  %s2055_s12 = smov [#allocation2]  }
  0x25   :  { %v351_v52 = vld [vmem:[%s2507_s4 + $0x8] sm:$0xff]  ;;  %v421_v14 = vshrl.u32 %v420_v13, 7  ;;  %v424_v15 = vand.u32 127, %v420_v13 }
  0x26   :  { %269 = vmatmul.mubr.bf16.vlgmr.msra.gmra.mrb[0].mxu0 %v1938_v34  ;;  %v365_v3 = vld [vmem:[%s2508_s5 + $0x8] sm:$0xff] }
  0x27   :  { %278 = vmatprep.mubr.bf16.mxu0 %v2050_v2  ;;  %v364_v2 = vld [vmem:[%s2508_s5] sm:$0xff]  ;;  %v422_v16 = vadd.s32 8, %v421_v14  ;;  %vm2251_vm1 = vcmp.le.s32.totalorder %v424_v15, %v421_v14 }
  0x29   :  { %vm2255_vm3 = vcmp.le.s32.totalorder %v424_v15, %v422_v16  ;;  %v1948_v15 = vld [vmem:[%s2505_s2] sm:$0xff]  }
  0x2a   :  { %332 = vmatmul.mubr.bf16.gmra.mrb[4].mxu1 %v1945_v36 }
  0x2e   :  { %279 = vmatmul.mubr.bf16.gmra.mrb[4].mxu0 %v1945_v36 }
  0x7f   :  { %v381_v37 = vpop.permute.xlu0 %380 }
  0x83   :  { %v383_v41 = vpop.permute.xlu0 %382 }
  0xf5   :  { %v323_v38 = vpop.f32.mrb[0].mxu1 }
  0xf6   :  { %v325_v39 = vpop.f32.mrb[1].mxu1  ;;  %v392_v40 = vmul.f32 %v381_v37, %v323_v38  ;;  %v368_v5 = vmul.f32 %v364_v2, %v323_v38 }
  0xf7   :  { %v327_v42 = vpop.f32.mrb[2].mxu1 }
  0xf8   :  { %400 = vrot.lane.b32.xlu1 %v392_v40, %s2051_s19  ;;  %v329_v44 = vpop.f32.mrb[3].mxu1  ;;  %v393_v49 = vmul.f32 %v383_v41, %v327_v42  ;;  %v369_v6 = vmul.f32 %v365_v3, %v327_v42 }
  0xf9   :  { %v2219_v46 = vpack.c.bf16 %v329_v44, %v325_v39  ;;  %v270_v47 = vpop.f32.mrb[0].mxu0 }
  0xfa   :  { %v346_v50 = vmul.f32 %v342_v43, %v270_v47  ;;  %v272_v51 = vpop.f32.mrb[1].mxu0 }
  0xfb   :  { %v354_v53 = vmul.f32 %v350_v45, %v272_v51  ;;  %v274_v54 = vpop.f32.mrb[2].mxu0 }
  0xfc   :  { %402 = vrot.lane.b32.xlu1 %v393_v49, %s2051_s19  ;;  %v347_v55 = vmul.f32 %v343_v48, %v274_v54  ;;  %v276_v56 = vpop.f32.mrb[3].mxu0 }
  0xfd   :  { %v358_v57 = vadd.f32 %v354_v53, %v346_v50  ;;  %v355_v58 = vmul.f32 %v351_v52, %v276_v56  ;;  %v2234_v61 = vpop.f32.mrb[4].mxu1  ;;  %v1946_v52 = vld [vmem:[%s2505_s2 + $0x10] sm:$0xff]   ;;  %v2053_v53 = vmov 0.0  }
  0xfe   :  { %v335_v62 = vpop.f32.mrb[5].mxu1  ;;  %1760 = vmatprep.subr.bf16.mxu0 %v2053_v53  ;;  %1764 = vmatprep.mubr.msk.bf16.mxu0 %vm2054_vm4, %v2053_v53 }
  0xff   :  { %v359_v59 = vadd.f32 %v355_v58, %v347_v55  ;;  %v2236_v63 = vpop.f32.mrb[6].mxu1  ;;  %1761 = vmatpush3.bf16.msra.mxu0 %v1946_v52 }
 0x100   :  { %v339_v0 = vpop.f32.mrb[7].mxu1  ;;  %1762 = vmatprep.subr.bf16.mxu0 %v2053_v53 }
 0x101   :  { %v2228_v60 = vpack.c.bf16 %v359_v59, %v358_v57  ;;  %v2238_v1 = vpack.c.bf16 %v339_v0, %v335_v62 }
 0x103   :  { %428 = vrot.lane.b32.xlu0 %v2228_v60, %s2052_s11  ;;  %1750 = vmatprep.mubr.msk.bf16.mxu1 %vm430_vm0, %v2228_v60 }
 0x16a   :  { %v401_v4 = vpop.permute.xlu1 %400 }
 0x16b   :  { %v412_v8 = vadd.f32 %v401_v4, %v368_v5 }
 0x16e   :  { %v403_v7 = vpop.permute.xlu1 %402 }
 0x16f   :  { %v413_v9 = vadd.f32 %v403_v7, %v369_v6 }
 0x171   :  { %v416_v10 = vpack.c.bf16 %v413_v9, %v412_v8 }
 0x173   :  { %1884 = vmatprep.subr.msk.bf16.mxu1 %vm430_vm0, %v416_v10  ;;  %v438_v11 = vsel %vm430_vm0, %v416_v10, 0 }
 0x174   :  { %1749 = vmatpush3.bf16.xpose.msra.mxu1 %v438_v11  ;;  %v1947_v11 = vld [vmem:[%s2505_s2 + $0x18] sm:$0xff]  }
 0x175   :  { %1754 = vmatprep.subr.bf16.mxu1 %v2219_v46  ;;  %v429_v12 = vpop.permute.xlu0 %428  ;;  %1763 = vmatpush3.bf16.msra.mxu0 %v1947_v11 }
 0x176   :  { %1768 = vmatprep.subr.bf16.mxu0 %v2053_v53 }
 0x17b   :  { %1751 = vmatmul.mubr.msk.bf16.vlgmr.msra.gmra.mrb[8].mxu1 %vm430_vm0, %v429_v12 }
 0x17c   :  { %1755 = vmatpush3.bf16.msra.mxu1 %v2219_v46 }
 0x24e   :  { %v1752_v18 = vpop.f32.mrb[8].mxu1 }
 0x24f   :  { %v474_v19 = vpop.f32.mrb[9].mxu1  ;;  %v491_v28 = vsel %vm2251_vm1, %v1752_v18, -3.4028235e+38 }
 0x250   :  { %v489_v21 = vsel %vm2251_vm1, %v474_v19, -3.4028235e+38  ;;  %v1753_v22 = vpop.f32.mrb[10].mxu1  ;;  %v500_v30 = vsel %vm493_vm2, %v491_v28, -inf }
 0x251   :  { %v477_v23 = vpop.f32.mrb[11].mxu1  ;;  %v494_v24 = vsel %vm493_vm2, %v489_v21, -inf  ;;  %v492_v25 = vsel %vm2255_vm3, %v1753_v22, -3.4028235e+38 }
 0x252   :  { %v490_v26 = vsel %vm2255_vm3, %v477_v23, -3.4028235e+38  ;;  %495 = vmax.xlane.f32.xlu1 %v494_v24  ;;  %v503_v29 = vsel %vm493_vm2, %v492_v25, -inf }
 0x253   :  { %v497_v27 = vsel %vm493_vm2, %v490_v26, -inf }
 0x254   :  { %498 = vmax.xlane.f32.xlu0 %v497_v27 }
 0x256   :  { %504 = vmax.xlane.f32.xlu1 %v503_v29 }
 0x258   :  { %501 = vmax.xlane.f32.xlu0 %v500_v30 }
 0x2df   :  { %v496_v31 = vpop.xlane.xlu1 %495 }
 0x2e0   :  { %v506_v35 = vsub.f32 %v489_v21, %v496_v31  ;;  %v1949_v21 = vld [vmem:[%s2505_s2 + $0x8] sm:$0xff]  }
 0x2e1   :  { %v499_v32 = vpop.xlane.xlu0 %498 }
 0x2e2   :  { %v507_v33 = vsub.f32 %v490_v26, %v499_v32  ;;  %v510_v41 = vmul.f32 1.442695, %v506_v35  ;;  %v375_v35 = vld [vmem:[%s2509_s6 + $0x18] sm:$0xff] }
 0x2e3   :  { %v505_v34 = vpop.xlane.xlu1 %504 }
 0x2e4   :  { %v509_v36 = vsub.f32 %v492_v25, %v505_v34  ;;  %v512_v37 = vmul.f32 1.442695, %v507_v33  ;;  %v374_v34 = vld [vmem:[%s2509_s6 + $0x10] sm:$0xff] }
 0x2e5   :  { %v502_v38 = vpop.xlane.xlu0 %501 }
 0x2e6   :  { %v516_v39 = vmul.f32 1.442695, %v509_v36  ;;  %v508_v40 = vsub.f32 %v491_v28, %v502_v38  ;;  %v280_v36 = vpop.f32.mrb[4].mxu0  ;;  %v352_v38 = vld [vmem:[%s2507_s4 + $0x10] sm:$0xff] }
 0x2e8   :  { %1962 = vpow2.f32 %v516_v39  ;;  %v514_v42 = vmul.f32 1.442695, %v508_v40  ;;  %v345_v39 = vld [vmem:[%s2506_s3 + $0x18] sm:$0xff]  ;;  %v282_v40 = vpop.f32.mrb[5].mxu0 }
 0x2e9   :  { %1964 = vpow2.f32 %v512_v37  ;;  %v344_v37 = vld [vmem:[%s2506_s3 + $0x10] sm:$0xff]  ;;  %s1615_s3 = sshll.u32 %s2055_s12, 4  ;;  %s1616_s3 = int_to_ptr.vmem [resolvable:$true] %s1615_s3 }
 0x2ea   :  { %1966 = vpow2.f32 %v514_v42  ;;  %v356_v42 = vmul.f32 %v352_v38, %v282_v40  ;;  %p2031_p1 = scmp.lt.s32.totalorder %s1616_s3, %s1616_s3 }
 0x2eb   :  { %1968 = vpow2.f32 %v510_v41  ;;  %v353_v41 = vld [vmem:[%s2507_s4 + $0x18] sm:$0xff]  ;;  %s2026_s4 = scalar_lea.vmem %s1616_s3, 512 }
 0x2ec   :  { %p2027_p0 = scmp.ne.s32.totalorder %s1616_s3, %s2026_s4  ;;  %p2032_p2 = scmp.lt.s32.totalorder %s2026_s4, %s2026_s4 }
 0x2ee   :  { %p2033_p3 = por %p2032_p2, %p2031_p1 }
 0x2f0   :  { %p2034_p4 = pnand %p2033_p3, %p2027_p0 }
 0x2f2   :  { %v1963_v43 = vpop.eup %1962 }
 0x2f3   :  { %v1965_v44 = vpop.eup %1964  ;;  %v527_v45 = vsel %vm493_vm2, %v1963_v43, 0.0 }
 0x2f4   :  { %v1967_v47 = vpop.eup %1966  ;;  %528 = vadd.xlane.f32.xlu1 %v527_v45  ;;  %v521_v50 = vsel %vm493_vm2, %v1965_v44, 0.0 }
 0x2f5   :  { %v524_v48 = vsel %vm493_vm2, %v1967_v47, 0.0  ;;  %v1969_v49 = vpop.eup %1968 }
 0x2f6   :  { %525 = vadd.xlane.f32.xlu0 %v524_v48  ;;  %v518_v51 = vsel %vm493_vm2, %v1969_v49, 0.0 }
 0x2f8   :  { %522 = vadd.xlane.f32.xlu1 %v521_v50 }
 0x2fa   :  { %519 = vadd.xlane.f32.xlu0 %v518_v51 }
 0x309   :  { %717 = vrot.lane.b32.xlu1 %v2228_v60, %s2051_s19 }
 0x30d   :  { %719 = vrot.lane.b32.xlu1 %v429_v12, %s2051_s19 }
 0x310   :  { %722 = vrot.lane.b32.xlu0 %v416_v10, %s2052_s11 }
 0x381   :  { %v529_v54 = vpop.xlane.xlu1 %528 }
 0x383   :  { %v526_v55 = vpop.xlane.xlu0 %525 }
 0x384   :  { %1970 = vrcp.f32 %v526_v55 }
 0x385   :  { %v523_v56 = vpop.xlane.xlu1 %522 }
 0x386   :  { %1972 = vrcp.f32 %v523_v56 }
 0x387   :  { %1974 = vrcp.f32 %v529_v54  ;;  %v520_v57 = vpop.xlane.xlu0 %519 }
 0x388   :  { %1976 = vrcp.f32 %v520_v57 }
 0x389   :  { %v718_v8 = vpop.permute.xlu1 %717 }
 0x38b   :  { %v723_v58 = vpop.permute.xlu0 %722 }
 0x38c   :  { %1885 = vmatprep.subr.msk.bf16.mxu1 %vm430_vm0, %v723_v58  ;;  %v731_v9 = vsel %vm430_vm0, %v723_v58, 0 }
 0x38d   :  { %v720_v10 = vpop.permute.xlu1 %719 }
 0x38e   :  { %v1971_v59 = vpop.eup %1970 }
 0x38f   :  { %v536_v2 = vmul.f32 %v1971_v59, %v1967_v47 }
 0x390   :  { %v1973_v60 = vpop.eup %1972 }
 0x391   :  { %v1975_v62 = vpop.eup %1974  ;;  %v535_v4 = vmul.f32 %v1973_v60, %v1965_v44 }
 0x392   :  { %v1977_v0 = vpop.eup %1976  ;;  %v537_v5 = vmul.f32 %v1975_v62, %v1963_v43  ;;  %v284_v43 = vpop.f32.mrb[6].mxu0 }
 0x393   :  { %v534_v3 = vmul.f32 %v1977_v0, %v1969_v49  ;;  %v349_v44 = vmul.f32 %v345_v39, %v284_v43  ;;  %v286_v45 = vpop.f32.mrb[7].mxu0 }
 0x394   :  { %v539_v7 = vpack.c.bf16 %v537_v5, %v536_v2  ;;  %v357_v48 = vmul.f32 %v353_v41, %v286_v45  ;;  %v1951_v41 = vld [vmem:[%s2505_s2 + $0x28] sm:$0xff]  }
 0x395   :  { %v538_v6 = vpack.c.bf16 %v535_v4, %v534_v3 }
 0x396   :  { %v361_v49 = vadd.f32 %v357_v48, %v349_v44  ;;  %v1952_v48 = vld [vmem:[%s2505_s2 + $0x30] sm:$0xff]  }
 0x397   :  { %1756 = vmatprep.mubr.msk.bf16.mxu1 %vm493_vm2, %v538_v6 }
 0x398   :  { %1757 = vmatmul.mubr.msk.bf16.vlgmr.msra.gmra.mrb[12].mxu1 %vm493_vm2, %v539_v7 }
 0x399   :  { %1777 = vmatpush3.bf16.xpose.msra.mxu1 %v731_v9  ;;  %1778 = vmatprep.mubr.msk.bf16.mxu1 %vm430_vm0, %v718_v8 }
 0x3a0   :  { %1779 = vmatmul.mubr.msk.bf16.vlgmr.msra.gmra.mrb[16].mxu1 %vm430_vm0, %v720_v10 }
 0x46b   :  { %v1758_v12 = vpop.f32.mrb[12].mxu1 }
 0x46c   :  { %v580_v13 = vpop.f32.mrb[13].mxu1 }
 0x46d   :  { %v1759_v14 = vpop.f32.mrb[14].mxu1 }
 0x46e   :  { %v600_v16 = vpack.c.bf16 %v1759_v14, %v1758_v12  ;;  %v583_v18 = vpop.f32.mrb[15].mxu1 }
 0x46f   :  { %v595_v19 = vpack.c.bf16 %v583_v18, %v580_v13 }
 0x470   :  { %1765 = vmatmul.mubr.msk.bf16.vlgmr.msra.gmra.mrb[8].mxu0 %vm430_vm0, %v600_v16  ;;  %v1950_v16 = vld [vmem:[%s2505_s2 + $0x20] sm:$0xff]  }
 0x471   :  { %1769 = vmatpush3.bf16.msra.mxu0 %v1948_v15  ;;  %1772 = vmatprep.mubr.msk.bf16.mxu0 %vm2054_vm4, %v2053_v53 }
 0x472   :  { %1770 = vmatprep.subr.bf16.mxu0 %v2053_v53 }
 0x473   :  { %v1780_v22 = vpop.f32.mrb[16].mxu1 }
 0x474   :  { %v767_v23 = vpop.f32.mrb[17].mxu1  ;;  %v784_v28 = vsel %vm2251_vm1, %v1780_v22, -3.4028235e+38  ;;  %v366_v22 = vld [vmem:[%s2508_s5 + $0x10] sm:$0xff] }
 0x475   :  { %v782_v24 = vsel %vm2251_vm1, %v767_v23, -3.4028235e+38  ;;  %v1781_v25 = vpop.f32.mrb[18].mxu1  ;;  %1771 = vmatpush3.bf16.msra.mxu0 %v1949_v21  ;;  %v792_v31 = vsel %vm493_vm2, %v784_v28, -inf  ;;  %v367_v23 = vld [vmem:[%s2508_s5 + $0x18] sm:$0xff] }
 0x476   :  { %v770_v26 = vpop.f32.mrb[19].mxu1  ;;  %v786_v27 = vsel %vm493_vm2, %v782_v24, -inf  ;;  %1788 = vmatprep.subr.bf16.mxu0 %v2053_v53  ;;  %v785_v32 = vsel %vm2255_vm3, %v1781_v25, -3.4028235e+38 }
 0x477   :  { %v783_v29 = vsel %vm2255_vm3, %v770_v26, -3.4028235e+38  ;;  %787 = vmax.xlane.f32.xlu0 %v786_v27  ;;  %v795_v33 = vsel %vm493_vm2, %v785_v32, -inf  ;;  %v370_v26 = vmul.f32 %v366_v22, %v2234_v61  ;;  %v371_v27 = vmul.f32 %v367_v23, %v2236_v63 }
 0x478   :  { %v789_v30 = vsel %vm493_vm2, %v783_v29, -inf }
 0x479   :  { %790 = vmax.xlane.f32.xlu1 %v789_v30 }
 0x47b   :  { %793 = vmax.xlane.f32.xlu0 %v792_v31 }
 0x47c   :  { %1773 = vmatmul.mubr.msk.bf16.vlgmr.msra.gmra.mrb[8].mxu0 %vm430_vm0, %v595_v19 }
 0x47d   :  { %1792 = vmatprep.mubr.msk.bf16.mxu0 %vm2054_vm4, %v2053_v53  ;;  %1789 = vmatpush3.bf16.msra.mxu0 %v1950_v16 }
 0x47e   :  { %1790 = vmatprep.subr.bf16.mxu0 %v2053_v53 }
 0x47f   :  { %796 = vmax.xlane.f32.xlu0 %v795_v33 }
 0x481   :  { %1791 = vmatpush3.bf16.msra.mxu0 %v1951_v41 }
 0x482   :  { %1796 = vmatprep.subr.bf16.mxu0 %v2053_v53 }
 0x48a   :  { %384 = vrot.lane.b32.xlu1 %v374_v34, %s2051_s19 }
 0x48e   :  { %833 = vrot.lane.b32.xlu1 %v2219_v46, %s2052_s11  ;;  %v348_v46 = vmul.f32 %v344_v37, %v280_v36 }
 0x490   :  { %v360_v47 = vadd.f32 %v356_v42, %v348_v46 }
 0x492   :  { %v2344_v50 = vpack.c.bf16 %v361_v49, %v360_v47 }
 0x495   :  { %386 = vrot.lane.b32.xlu0 %v375_v35, %s2051_s19 }
 0x504   :  { %v788_v51 = vpop.xlane.xlu0 %787 }
 0x505   :  { %v798_v54 = vsub.f32 %v782_v24, %v788_v51  ;;  %v1953_v51 = vld [vmem:[%s2505_s2 + $0x38] sm:$0xff]  }
 0x506   :  { %v791_v52 = vpop.xlane.xlu1 %790 }
 0x507   :  { %v802_v58 = vmul.f32 1.442695, %v798_v54  ;;  %v799_v59 = vsub.f32 %v783_v29, %v791_v52 }
 0x508   :  { %v794_v55 = vpop.xlane.xlu0 %793 }
 0x509   :  { %v800_v56 = vsub.f32 %v784_v28, %v794_v55  ;;  %v804_v3 = vmul.f32 1.442695, %v799_v59 }
 0x50a   :  { %v385_v57 = vpop.permute.xlu1 %384 }
 0x50b   :  { %v806_v60 = vmul.f32 1.442695, %v800_v56  ;;  %v394_v15 = vmul.f32 %v385_v57, %v2234_v61 }
 0x50c   :  { %v797_v62 = vpop.xlane.xlu0 %796 }
 0x50d   :  { %1978 = vpow2.f32 %v806_v60  ;;  %v801_v0 = vsub.f32 %v785_v32, %v797_v62 }
 0x50e   :  { %v834_v2 = vpop.permute.xlu1 %833  ;;  %1980 = vpow2.f32 %v802_v58 }
 0x50f   :  { %v808_v4 = vmul.f32 1.442695, %v801_v0  ;;  %1782 = vmatprep.subr.bf16.mxu1 %v834_v2 }
 0x510   :  { %1783 = vmatpush3.bf16.msra.mxu1 %v834_v2  ;;  %v387_v13 = vpop.permute.xlu0 %386 }
 0x511   :  { %1982 = vpow2.f32 %v808_v4  ;;  %v395_v14 = vmul.f32 %v387_v13, %v2236_v63 }
 0x512   :  { %1984 = vpow2.f32 %v804_v3 }
 0x517   :  { %v1979_v5 = vpop.eup %1978 }
 0x518   :  { %v816_v6 = vsel %vm493_vm2, %v1979_v5, 0.0  ;;  %v1981_v7 = vpop.eup %1980 }
 0x519   :  { %817 = vadd.xlane.f32.xlu1 %v816_v6  ;;  %v810_v10 = vsel %vm493_vm2, %v1981_v7, 0.0 }
 0x51b   :  { %v1983_v8 = vpop.eup %1982 }
 0x51c   :  { %v819_v9 = vsel %vm493_vm2, %v1983_v8, 0.0  ;;  %v1985_v11 = vpop.eup %1984 }
 0x51d   :  { %820 = vadd.xlane.f32.xlu0 %v819_v9  ;;  %811 = vadd.xlane.f32.xlu1 %v810_v10  ;;  %v813_v12 = vsel %vm493_vm2, %v1985_v11, 0.0 }
 0x521   :  { %814 = vadd.xlane.f32.xlu0 %v813_v12 }
 0x52e   :  { %406 = vrot.lane.b32.xlu1 %v395_v14, %s2051_s19 }
 0x532   :  { %1020 = vrot.lane.b32.xlu1 %v2344_v50, %s2052_s11 }
 0x537   :  { %404 = vrot.lane.b32.xlu0 %v394_v15, %s2051_s19 }
 0x5a6   :  { %v818_v18 = vpop.xlane.xlu1 %817 }
 0x5aa   :  { %v821_v19 = vpop.xlane.xlu0 %820  ;;  %v812_v21 = vpop.xlane.xlu1 %811 }
 0x5ab   :  { %1986 = vrcp.f32 %v821_v19 }
 0x5ac   :  { %1988 = vrcp.f32 %v812_v21 }
 0x5ad   :  { %1990 = vrcp.f32 %v818_v18 }
 0x5ae   :  { %v815_v24 = vpop.xlane.xlu0 %814  ;;  %v407_v25 = vpop.permute.xlu1 %406 }
 0x5af   :  { %1992 = vrcp.f32 %v815_v24  ;;  %v415_v29 = vadd.f32 %v407_v25, %v371_v27 }
 0x5b2   :  { %v405_v28 = vpop.permute.xlu0 %404  ;;  %v2379_v40 = vpop.permute.xlu1 %1020 }
 0x5b3   :  { %v414_v30 = vadd.f32 %v405_v28, %v370_v26  ;;  %v1954_v26 = vld [vmem:[%s2505_s2 + $0x10] sm:$0xff]  }
 0x5b5   :  { %v2368_v31 = vpack.c.bf16 %v415_v29, %v414_v30  ;;  %v1987_v32 = vpop.eup %1986 }
 0x5b6   :  { %v1989_v33 = vpop.eup %1988  ;;  %v829_v36 = vmul.f32 %v1987_v32, %v1983_v8 }
 0x5b7   :  { %1886 = vmatprep.subr.msk.bf16.mxu1 %vm430_vm0, %v2368_v31  ;;  %v1991_v34 = vpop.eup %1990  ;;  %v826_v37 = vmul.f32 %v1989_v33, %v1981_v7  ;;  %v1029_v63 = vsel %vm430_vm0, %v2368_v31, 0 }
 0x5b8   :  { %v828_v39 = vmul.f32 %v1991_v34, %v1979_v5 }
 0x5b9   :  { %v1993_v35 = vpop.eup %1992 }
 0x5ba   :  { %v827_v38 = vmul.f32 %v1993_v35, %v1985_v11  ;;  %v831_v61 = vpack.c.bf16 %v829_v36, %v828_v39 }
 0x5bc   :  { %v830_v46 = vpack.c.bf16 %v827_v38, %v826_v37 }
 0x5be   :  { %1784 = vmatprep.mubr.msk.bf16.mxu1 %vm493_vm2, %v830_v46 }
 0x5bf   :  { %1785 = vmatmul.mubr.msk.bf16.vlgmr.msra.gmra.mrb[20].mxu1 %vm493_vm2, %v831_v61 }
 0x5c0   :  { %1805 = vmatpush3.bf16.xpose.msra.mxu1 %v1029_v63  ;;  %1806 = vmatprep.mubr.msk.bf16.mxu1 %vm430_vm0, %v2344_v50 }
 0x5c1   :  { %1810 = vmatprep.subr.bf16.mxu1 %v2238_v1 }
 0x5c7   :  { %1807 = vmatmul.mubr.msk.bf16.vlgmr.msra.gmra.mrb[24].mxu1 %vm430_vm0, %v2379_v40 }
 0x5c8   :  { %1811 = vmatpush3.bf16.msra.mxu1 %v2238_v1 }
 0x692   :  { %v1786_v42 = vpop.f32.mrb[20].mxu1 }
 0x693   :  { %v876_v43 = vpop.f32.mrb[21].mxu1 }
 0x694   :  { %v1787_v44 = vpop.f32.mrb[22].mxu1 }
 0x695   :  { %v954_v45 = vpack.c.bf16 %v1787_v44, %v1786_v42  ;;  %v879_v47 = vpop.f32.mrb[23].mxu1 }
 0x696   :  { %v891_v49 = vpack.c.bf16 %v879_v47, %v876_v43 }
 0x698   :  { %1793 = vmatmul.mubr.msk.bf16.vlgmr.msra.gmra.mrb[8].mxu0 %vm430_vm0, %v891_v49 }
 0x699   :  { %1797 = vmatpush3.bf16.msra.mxu0 %v1952_v48  ;;  %1800 = vmatprep.mubr.msk.bf16.mxu0 %vm2054_vm4, %v2053_v53 }
 0x69a   :  { %v1808_v52 = vpop.f32.mrb[24].mxu1  ;;  %1798 = vmatprep.subr.bf16.mxu0 %v2053_v53 }
 0x69b   :  { %v1065_v54 = vpop.f32.mrb[25].mxu1  ;;  %v1082_v59 = vsel %vm2251_vm1, %v1808_v52, -3.4028235e+38 }
 0x69c   :  { %v1080_v55 = vsel %vm2251_vm1, %v1065_v54, -3.4028235e+38  ;;  %v1809_v56 = vpop.f32.mrb[26].mxu1  ;;  %v1090_v0 = vsel %vm493_vm2, %v1082_v59, -inf }
 0x69d   :  { %v1068_v57 = vpop.f32.mrb[27].mxu1  ;;  %v1084_v58 = vsel %vm493_vm2, %v1080_v55, -inf  ;;  %1799 = vmatpush3.bf16.msra.mxu0 %v1953_v51  ;;  %v1083_v2 = vsel %vm2255_vm3, %v1809_v56, -3.4028235e+38  ;;  %v1956_v51 = vld [vmem:[%s2505_s2] sm:$0xff]   ;;  %v1957_v56 = vld [vmem:[%s2505_s2 + $0x8] sm:$0xff]  }
 0x69e   :  { %v1081_v60 = vsel %vm2255_vm3, %v1068_v57, -3.4028235e+38  ;;  %1085 = vmax.xlane.f32.xlu0 %v1084_v58  ;;  %1816 = vmatprep.subr.bf16.mxu0 %v2053_v53  ;;  %v1093_v3 = vsel %vm493_vm2, %v1083_v2, -inf }
 0x69f   :  { %v1087_v62 = vsel %vm493_vm2, %v1081_v60, -inf }
 0x6a0   :  { %1088 = vmax.xlane.f32.xlu1 %v1087_v62 }
 0x6a2   :  { %1091 = vmax.xlane.f32.xlu0 %v1090_v0 }
 0x6a4   :  { %1801 = vmatmul.mubr.msk.bf16.vlgmr.msra.gmra.mrb[8].mxu0 %vm430_vm0, %v954_v45  ;;  %v1955_v45 = vld [vmem:[%s2505_s2 + $0x18] sm:$0xff]  }
 0x6a5   :  { %1820 = vmatprep.mubr.msk.bf16.mxu0 %vm2054_vm4, %v2053_v53  ;;  %1817 = vmatpush3.bf16.msra.mxu0 %v1954_v26 }
 0x6a6   :  { %1094 = vmax.xlane.f32.xlu0 %v1093_v3  ;;  %1818 = vmatprep.subr.bf16.mxu0 %v2053_v53 }
 0x6a9   :  { %1819 = vmatpush3.bf16.msra.mxu0 %v1955_v45  ;;  %v1960_v45 = vld [vmem:[%s2505_s2 + $0x30] sm:$0xff]  }
 0x6aa   :  { %1824 = vmatprep.subr.bf16.mxu0 %v2053_v53 }
 0x72b   :  { %v1086_v4 = vpop.xlane.xlu0 %1085 }
 0x72c   :  { %v1096_v6 = vsub.f32 %v1080_v55, %v1086_v4 }
 0x72d   :  { %v1089_v5 = vpop.xlane.xlu1 %1088 }
 0x72e   :  { %v1097_v7 = vsub.f32 %v1081_v60, %v1089_v5  ;;  %v1100_v11 = vmul.f32 1.442695, %v1096_v6 }
 0x72f   :  { %v1092_v8 = vpop.xlane.xlu0 %1091 }
 0x730   :  { %v1102_v9 = vmul.f32 1.442695, %v1097_v7  ;;  %v1098_v10 = vsub.f32 %v1082_v59, %v1092_v8 }
 0x732   :  { %1994 = vpow2.f32 %v1102_v9  ;;  %v1104_v12 = vmul.f32 1.442695, %v1098_v10 }
 0x733   :  { %v1095_v13 = vpop.xlane.xlu0 %1094 }
 0x734   :  { %1996 = vpow2.f32 %v1104_v12  ;;  %v1099_v14 = vsub.f32 %v1083_v2, %v1095_v13 }
 0x735   :  { %1998 = vpow2.f32 %v1100_v11 }
 0x736   :  { %v1106_v15 = vmul.f32 1.442695, %v1099_v14 }
 0x738   :  { %2000 = vpow2.f32 %v1106_v15 }
 0x73c   :  { %v1995_v16 = vpop.eup %1994 }
 0x73d   :  { %v1111_v18 = vsel %vm493_vm2, %v1995_v16, 0.0 }
 0x73e   :  { %v1997_v19 = vpop.eup %1996  ;;  %1112 = vadd.xlane.f32.xlu0 %v1111_v18 }
 0x73f   :  { %v1114_v21 = vsel %vm493_vm2, %v1997_v19, 0.0  ;;  %v1999_v22 = vpop.eup %1998 }
 0x740   :  { %1115 = vadd.xlane.f32.xlu1 %v1114_v21  ;;  %v1108_v24 = vsel %vm493_vm2, %v1999_v22, 0.0 }
 0x742   :  { %v2001_v23 = vpop.eup %2000 }
 0x743   :  { %v1117_v25 = vsel %vm493_vm2, %v2001_v23, 0.0 }
 0x744   :  { %1109 = vadd.xlane.f32.xlu1 %v1108_v24  ;;  %1118 = vadd.xlane.f32.xlu0 %v1117_v25 }
 0x755   :  { %1312 = vrot.lane.b32.xlu1 %v2368_v31, %s2052_s11 }
 0x759   :  { %1309 = vrot.lane.b32.xlu1 %v2379_v40, %s2051_s19 }
 0x75a   :  { %1307 = vrot.lane.b32.xlu0 %v2344_v50, %s2051_s19 }
 0x777   :  { %v1008_v27 = vpop.f32.mrb[8].mxu0 }
 0x778   :  { %1017 = vst [vmem:[#allocation2] sm:$0xff] %v1008_v27  ;;  %v1802_v28 = vpop.f32.mrb[9].mxu0 }
 0x779   :  { %v1011_v29 = vpop.f32.mrb[10].mxu0  ;;  %v1958_v28 = vld [vmem:[%s2505_s2 + $0x20] sm:$0xff]  }
 0x77a   :  { %1018 = vst [vmem:[#allocation2 + $0x8] sm:$0xff] %v1011_v29  ;;  %v1803_v30 = vpop.f32.mrb[11].mxu0 }
 0x7cb   :  { %v1113_v31 = vpop.xlane.xlu0 %1112 }
 0x7cd   :  { %v1116_v32 = vpop.xlane.xlu1 %1115 }
 0x7ce   :  { %2002 = vrcp.f32 %v1116_v32 }
 0x7cf   :  { %2004 = vrcp.f32 %v1113_v31 }
 0x7d1   :  { %v1119_v33 = vpop.xlane.xlu0 %1118  ;;  %v1110_v34 = vpop.xlane.xlu1 %1109 }
 0x7d2   :  { %2006 = vrcp.f32 %v1119_v33 }
 0x7d3   :  { %2008 = vrcp.f32 %v1110_v34 }
 0x7d5   :  { %v1313_v50 = vpop.permute.xlu1 %1312  ;;  %v1308_v42 = vpop.permute.xlu0 %1307 }
 0x7d6   :  { %1887 = vmatprep.subr.msk.bf16.mxu1 %vm430_vm0, %v1313_v50  ;;  %v1321_v43 = vsel %vm430_vm0, %v1313_v50, 0 }
 0x7d8   :  { %v2003_v35 = vpop.eup %2002 }
 0x7d9   :  { %v2005_v36 = vpop.eup %2004  ;;  %v1126_v39 = vmul.f32 %v2003_v35, %v1997_v19  ;;  %v1310_v44 = vpop.permute.xlu1 %1309 }
 0x7da   :  { %v1125_v63 = vmul.f32 %v2005_v36, %v1995_v16 }
 0x7dc   :  { %v2007_v37 = vpop.eup %2006 }
 0x7dd   :  { %v2009_v38 = vpop.eup %2008  ;;  %v1127_v46 = vmul.f32 %v2007_v37, %v2001_v23 }
 0x7de   :  { %v1124_v61 = vmul.f32 %v2009_v38, %v1999_v22 }
 0x7df   :  { %v1129_v40 = vpack.c.bf16 %v1127_v46, %v1126_v39 }
 0x7e0   :  { %v1128_v41 = vpack.c.bf16 %v1125_v63, %v1124_v61  ;;  %v1959_v63 = vld [vmem:[%s2505_s2 + $0x28] sm:$0xff]  }
 0x7e2   :  { %1812 = vmatprep.mubr.msk.bf16.mxu1 %vm493_vm2, %v1128_v41 }
 0x7e3   :  { %1813 = vmatmul.mubr.msk.bf16.vlgmr.msra.gmra.mrb[28].mxu1 %vm493_vm2, %v1129_v40 }
 0x7e4   :  { %1833 = vmatpush3.bf16.xpose.msra.mxu1 %v1321_v43  ;;  %1834 = vmatprep.mubr.msk.bf16.mxu1 %vm430_vm0, %v1308_v42 }
 0x7eb   :  { %1835 = vmatmul.mubr.msk.bf16.vlgmr.msra.gmra.mrb[32].mxu1 %vm430_vm0, %v1310_v44 }
 0x8b6   :  { %v1814_v47 = vpop.f32.mrb[28].mxu1 }
 0x8b7   :  { %v1170_v48 = vpop.f32.mrb[29].mxu1 }
 0x8b8   :  { %v1815_v49 = vpop.f32.mrb[30].mxu1 }
 0x8b9   :  { %v1190_v52 = vpack.c.bf16 %v1815_v49, %v1814_v47  ;;  %v1173_v54 = vpop.f32.mrb[31].mxu1 }
 0x8ba   :  { %v1185_v55 = vpack.c.bf16 %v1173_v54, %v1170_v48  ;;  %v1961_v48 = vld [vmem:[%s2505_s2 + $0x38] sm:$0xff]  }
 0x8bb   :  { %1821 = vmatmul.mubr.msk.bf16.vlgmr.msra.gmra.mrb[12].mxu0 %vm430_vm0, %v1190_v52 }
 0x8bc   :  { %1825 = vmatpush3.bf16.msra.mxu0 %v1956_v51  ;;  %1828 = vmatprep.mubr.msk.bf16.mxu0 %vm2054_vm4, %v2053_v53 }
 0x8bd   :  { %1826 = vmatprep.subr.bf16.mxu0 %v2053_v53 }
 0x8be   :  { %v1836_v57 = vpop.f32.mrb[32].mxu1 }
 0x8bf   :  { %v1357_v58 = vpop.f32.mrb[33].mxu1  ;;  %v1374_v5 = vsel %vm2251_vm1, %v1836_v57, -3.4028235e+38 }
 0x8c0   :  { %v1372_v59 = vsel %vm2251_vm1, %v1357_v58, -3.4028235e+38  ;;  %v1837_v60 = vpop.f32.mrb[34].mxu1  ;;  %1827 = vmatpush3.bf16.msra.mxu0 %v1957_v56  ;;  %v1382_v7 = vsel %vm493_vm2, %v1374_v5, -inf }
 0x8c1   :  { %v1360_v62 = vpop.f32.mrb[35].mxu1  ;;  %v1376_v0 = vsel %vm493_vm2, %v1372_v59, -inf  ;;  %1844 = vmatprep.subr.bf16.mxu0 %v2053_v53  ;;  %v1375_v2 = vsel %vm2255_vm3, %v1837_v60, -3.4028235e+38 }
 0x8c2   :  { %v1373_v3 = vsel %vm2255_vm3, %v1360_v62, -3.4028235e+38  ;;  %1377 = vmax.xlane.f32.xlu1 %v1376_v0  ;;  %v1385_v6 = vsel %vm493_vm2, %v1375_v2, -inf }
 0x8c3   :  { %v1379_v4 = vsel %vm493_vm2, %v1373_v3, -inf }
 0x8c4   :  { %1380 = vmax.xlane.f32.xlu0 %v1379_v4 }
 0x8c6   :  { %1386 = vmax.xlane.f32.xlu1 %v1385_v6 }
 0x8c7   :  { %1829 = vmatmul.mubr.msk.bf16.vlgmr.msra.gmra.mrb[12].mxu0 %vm430_vm0, %v1185_v55 }
 0x8c8   :  { %1383 = vmax.xlane.f32.xlu0 %v1382_v7  ;;  %1848 = vmatprep.mubr.msk.bf16.mxu0 %vm2054_vm4, %v2053_v53 }
 0x8c9   :  { %1845 = vmatpush3.bf16.msra.mxu0 %v1958_v28 }
 0x8ca   :  { %1846 = vmatprep.subr.bf16.mxu0 %v2053_v53 }
 0x8cd   :  { %1847 = vmatpush3.bf16.msra.mxu0 %v1959_v63 }
 0x8ce   :  { %1852 = vmatprep.subr.bf16.mxu0 %v2053_v53 }
 0x94f   :  { %v1378_v20 = vpop.xlane.xlu1 %1377 }
 0x950   :  { %v1388_v11 = vsub.f32 %v1372_v59, %v1378_v20 }
 0x951   :  { %v1381_v8 = vpop.xlane.xlu0 %1380 }
 0x952   :  { %v1389_v9 = vsub.f32 %v1373_v3, %v1381_v8  ;;  %v1392_v16 = vmul.f32 1.442695, %v1388_v11 }
 0x953   :  { %v1387_v10 = vpop.xlane.xlu1 %1386 }
 0x954   :  { %v1394_v12 = vmul.f32 1.442695, %v1389_v9  ;;  %v1391_v17 = vsub.f32 %v1375_v2, %v1387_v10 }
 0x955   :  { %v1384_v13 = vpop.xlane.xlu0 %1383 }
 0x956   :  { %2010 = vpow2.f32 %v1394_v12  ;;  %v1398_v14 = vmul.f32 1.442695, %v1391_v17  ;;  %v1390_v15 = vsub.f32 %v1374_v5, %v1384_v13 }
 0x958   :  { %2012 = vpow2.f32 %v1398_v14  ;;  %v1396_v18 = vmul.f32 1.442695, %v1390_v15 }
 0x95a   :  { %2014 = vpow2.f32 %v1396_v18 }
 0x95b   :  { %2016 = vpow2.f32 %v1392_v16 }
 0x960   :  { %v2011_v19 = vpop.eup %2010 }
 0x961   :  { %v1403_v21 = vsel %vm493_vm2, %v2011_v19, 0.0 }
 0x962   :  { %v2013_v22 = vpop.eup %2012  ;;  %1404 = vadd.xlane.f32.xlu1 %v1403_v21 }
 0x963   :  { %v1409_v24 = vsel %vm493_vm2, %v2013_v22, 0.0 }
 0x964   :  { %v2015_v23 = vpop.eup %2014 }
 0x965   :  { %v1406_v25 = vsel %vm493_vm2, %v2015_v23, 0.0  ;;  %v2017_v26 = vpop.eup %2016 }
 0x966   :  { %1410 = vadd.xlane.f32.xlu1 %v1409_v24  ;;  %1407 = vadd.xlane.f32.xlu0 %v1406_v25  ;;  %v1400_v27 = vsel %vm493_vm2, %v2017_v26, 0.0 }
 0x96a   :  { %1401 = vadd.xlane.f32.xlu0 %v1400_v27 }
 0x980   :  { %1423 = vrot.lane.b32.xlu0 %v2238_v1, %s2052_s11 }
 0x9ef   :  { %v1405_v29 = vpop.xlane.xlu1 %1404 }
 0x9f3   :  { %v1411_v30 = vpop.xlane.xlu1 %1410  ;;  %v1408_v31 = vpop.xlane.xlu0 %1407 }
 0x9f4   :  { %2018 = vrcp.f32 %v1411_v30 }
 0x9f5   :  { %2020 = vrcp.f32 %v1408_v31 }
 0x9f6   :  { %2022 = vrcp.f32 %v1405_v29 }
 0x9f7   :  { %v1402_v32 = vpop.xlane.xlu0 %1401 }
 0x9f8   :  { %2024 = vrcp.f32 %v1402_v32 }
 0x9fb   :  { %v1424_v33 = vpop.permute.xlu0 %1423 }
 0x9fc   :  { %1838 = vmatprep.subr.bf16.mxu1 %v1424_v33 }
 0x9fd   :  { %1839 = vmatpush3.bf16.msra.mxu1 %v1424_v33 }
 0x9fe   :  { %v2019_v34 = vpop.eup %2018 }
 0x9ff   :  { %v2021_v1 = vpop.eup %2020  ;;  %v1419_v36 = vmul.f32 %v2019_v34, %v2013_v22 }
 0xa00   :  { %v2023_v50 = vpop.eup %2022  ;;  %v1418_v37 = vmul.f32 %v2021_v1, %v2015_v23 }
 0xa01   :  { %v1417_v39 = vmul.f32 %v2023_v50, %v2011_v19 }
 0xa02   :  { %v2025_v35 = vpop.eup %2024  ;;  %v1421_v61 = vpack.c.bf16 %v1419_v36, %v1418_v37 }
 0xa03   :  { %v1416_v38 = vmul.f32 %v2025_v35, %v2017_v26 }
 0xa05   :  { %v1420_v46 = vpack.c.bf16 %v1417_v39, %v1416_v38 }
 0xa07   :  { %1840 = vmatprep.mubr.msk.bf16.mxu1 %vm493_vm2, %v1420_v46 }
 0xa08   :  { %1841 = vmatmul.mubr.msk.bf16.vlgmr.msra.gmra.mrb[36].mxu1 %vm493_vm2, %v1421_v61 }
 0xadb   :  { %v1842_v40 = vpop.f32.mrb[36].mxu1 }
 0xadc   :  { %v1466_v41 = vpop.f32.mrb[37].mxu1 }
 0xadd   :  { %v1843_v42 = vpop.f32.mrb[38].mxu1 }
 0xade   :  { %v1544_v43 = vpack.c.bf16 %v1843_v42, %v1842_v40  ;;  %v1469_v44 = vpop.f32.mrb[39].mxu1 }
 0xadf   :  { %v1481_v47 = vpack.c.bf16 %v1469_v44, %v1466_v41 }
 0xae1   :  { %1849 = vmatmul.mubr.msk.bf16.vlgmr.msra.gmra.mrb[12].mxu0 %vm430_vm0, %v1481_v47 }
 0xae2   :  { %1853 = vmatpush3.bf16.msra.mxu0 %v1960_v45  ;;  %1856 = vmatprep.mubr.msk.bf16.mxu0 %vm2054_vm4, %v2053_v53 }
 0xae3   :  { %1854 = vmatprep.subr.bf16.mxu0 %v2053_v53 }
 0xae6   :  { %1855 = vmatpush3.bf16.msra.mxu0 %v1961_v48 }
 0xaed   :  { %1857 = vmatmul.mubr.msk.bf16.vlgmr.msra.gmra.mrb[12].mxu0 %vm430_vm0, %v1544_v43 }
 0xbc0   :  { %v1598_v49 = vpop.f32.mrb[12].mxu0 }
 0xbc1   :  { %1608 = vst [vmem:[#allocation2 + $0x10] sm:$0xff] %v1598_v49  ;;  %v1858_v51 = vpop.f32.mrb[13].mxu0 }
 0xbc2   :  { %v1601_v52 = vpop.f32.mrb[14].mxu0 }
 0xbc3   :  { %1609 = vst [vmem:[#allocation2 + $0x18] sm:$0xff] %v1601_v52  ;;  %v1859_v54 = vpop.f32.mrb[15].mxu0 }
 0xbc4   :  { %2037 = shalt.err (!%p2034_p4)
}
 0xbc5   :  { %s2038_s13 = scalar_lea.hbm %s2510_s7, 512 }
 0xbc6   :  { %p2039_p5 = scmp.ne.s32.totalorder %s2510_s7, %s2038_s13  ;;  %p2042_p6 = scmp.lt.u32.totalorder %s2038_s13, %s2510_s7 }
 0xbc8   :  { %p2044_p7 = pnand %p2042_p6, %p2039_p5 }
 0xbca   :  { %2047 = shalt.err (!%p2044_p7)
}
 0xbcb   :  { %s2056_s17 = smov 128   ;;  %s2057_s18 = smov 8  }
 0xbcc   :  { %1621 = dma.vmem_to_hbm [thread:$0]  %s1616_s3, 512, %s2510_s7, [#allocation3], %s2056_s17, %s2056_s17, %s2057_s18  }
 0xbcd   :  { %2048 = dma.done.wait [#allocation3], 512  }
 0xbce   :  { %2049 = vsyncadd [#allocation3], 4294966784 }
 0xbcf   :  { %1625 = vsyncpa [#allocation3], 1 }

</bundles_post_ra>
